<compile_context>
chip_gen: v6e
topology: v6e:2x2x1
jax: 0.10.0
libtpu: 0.0.40
codegen_flags: <defaults>
</compile_context>

<pallas_src>
import jax
import jax.numpy as jnp
from jax.experimental import pallas as pl
from jax.experimental.pallas import tpu as pltpu

LANE = 128


def _round_up(n, m):
    return ((n + m - 1) // m) * m


def _act(x, kind):
    if kind == "relu":
        return jnp.maximum(x, 0.0)
    if kind == "lrelu":
        return jnp.where(x > 0, x, 0.2 * x)
    if kind == "elu":
        # clamp exp arg on the untaken branch for safety with large inputs
        return jnp.where(x > 0, x, jnp.exp(jnp.minimum(x, 0.0)) - 1.0)
    raise ValueError(f"{kind} activation function is not supported!")


# ----------------------------- fused kernel ----------------------------------


def _make_graphsage_kernel(layers: int, gnn_act: str, feat: int):
    """One kernel computing the whole GraphSAGE stack on a dense adjacency.

    Per layer (SAGEConv, project=True, mean aggr, root_weight=True):
        xp  = relu(h @ W_proj + b_proj)
        agg = adj_norm @ xp                       (adj pre-normalized by 1/deg)
        out = [agg | h] @ [[W_l],[W_r]] + b_l
        h   = act(out)   for all but the last layer
    """

    def kernel(x_ref, adj_ref, wproj_ref, wlr_ref, b_ref, o_ref):
        adj = adj_ref[...]                      # [Np, Np] bf16, row-normalized
        bias = b_ref[...]                       # [layers, 2, F] f32
        h = x_ref[...]                          # [Np, F] f32

        for li in range(layers):                # static unroll
            h_bf = h.astype(jnp.bfloat16)

            # project=True: xp = relu(lin_proj(h))
            xp = jnp.dot(h_bf, wproj_ref[li],
                         preferred_element_type=jnp.float32) + bias[li, 0, :]
            xp = jnp.maximum(xp, 0.0)           # [Np, F] f32

            # mean aggregation over incoming neighbors (pre-normalized adj)
            agg = jnp.dot(adj, xp.astype(jnp.bfloat16),
                          preferred_element_type=jnp.float32)   # [Np, F] f32

            # fused out = lin_l(agg) + lin_r(h) + b_l  (one stacked-K matmul)
            cat = jnp.concatenate([agg.astype(jnp.bfloat16), h_bf], axis=1)
            out = jnp.dot(cat, wlr_ref[li],
                          preferred_element_type=jnp.float32) + bias[li, 1, :]

            if li < layers - 1:                 # act after all but last layer
                out = _act(out, gnn_act)
            h = out

        o_ref[...] = h                          # [Np, F] f32, unmasked lane-dense store

    return kernel


# --------------------------------- wrapper ------------------------------------


def graphsage_forward(x, adj, params, *, gnn_act, out_channels):
    """Pads/packs inputs, runs the fused GraphSAGE stack in one pallas_call."""
    n, in_ch = x.shape
    layers = len(params)
    np_ = _round_up(n, LANE)
    f = LANE                                   # uniform padded feature width

    # --- adjacency: zero-pad, row-normalize once with exact f32 divide, cast.
    adj_p = jnp.zeros((np_, np_), jnp.float32).at[:n, :n].set(adj)
    deg = jnp.maximum(jnp.sum(adj_p, axis=1, keepdims=True), 1.0)
    adj_norm = (adj_p / deg).astype(jnp.bfloat16)

    # --- node features: zero-pad rows and feature dim.
    x_p = jnp.zeros((np_, f), jnp.float32).at[:n, :in_ch].set(x)

    # --- pack per-layer parameters into three slabs.
    wproj = jnp.zeros((layers, f, f), jnp.float32)
    wlr = jnp.zeros((layers, 2 * f, f), jnp.float32)
    bias = jnp.zeros((layers, 2, f), jnp.float32)
    for li, p in enumerate(params):
        cin, cout = p["w_l"].shape
        wproj = wproj.at[li, :cin, :cin].set(p["w_proj"])
        wlr = wlr.at[li, :cin, :cout].set(p["w_l"])        # agg half  (lanes 0:F)
        wlr = wlr.at[li, f:f + cin, :cout].set(p["w_r"])   # root half (lanes F:2F)
        bias = bias.at[li, 0, :cin].set(p["b_proj"])
        bias = bias.at[li, 1, :cout].set(p["b_l"])
    wproj = wproj.astype(jnp.bfloat16)
    wlr = wlr.astype(jnp.bfloat16)

    vmem = pltpu.MemorySpace.VMEM
    out = pl.pallas_call(
        _make_graphsage_kernel(layers, gnn_act, f),
        out_shape=jax.ShapeDtypeStruct((np_, f), jnp.float32),
        in_specs=[pl.BlockSpec(memory_space=vmem)] * 5,
        out_specs=pl.BlockSpec(memory_space=vmem),
    )(x_p, adj_norm, wproj, wlr, bias)

    return out[:n, :out_channels]


# --------------------------- parameter setup ---------------------------------


def _glorot(key, shape):
    fan_in, fan_out = shape[-2], shape[-1]
    lim = (6.0 / (fan_in + fan_out)) ** 0.5
    return jax.random.uniform(key, shape, jnp.float32, -lim, lim)


def init_graphsage_params(key, in_channels, hidden_channels, out_channels, layers):
    """Deterministic synthetic params for the stacked SAGEConv layers (f32,
    unpadded; packing/padding/casting happens in graphsage_forward)."""
    params = []
    for layer in range(layers):
        if layer == 0:
            cin, cout = in_channels, hidden_channels
        elif layer == layers - 1:
            cin, cout = hidden_channels, out_channels
        else:
            cin, cout = hidden_channels, hidden_channels

        key, k1, k2, k3, k4, k5 = jax.random.split(key, 6)
        params.append(dict(
            w_proj=_glorot(k1, (cin, cin)),
            b_proj=0.01 * jax.random.normal(k4, (cin,), jnp.float32),
            w_l=_glorot(k2, (cin, cout)),
            w_r=_glorot(k3, (cin, cout)),
            b_l=0.01 * jax.random.normal(k5, (cout,), jnp.float32),
        ))
    return params


# --------------------------------- main --------------------------------------


if __name__ == "__main__":
    N = 64               # number of graph nodes
    IN_CH = 16
    HIDDEN = 32
    OUT_CH = 16
    LAYERS = 3
    GNN_ACT = "elu"

    key = jax.random.PRNGKey(0)
    kx, kp = jax.random.split(key)

    # node features
    x = jax.random.normal(kx, (N, IN_CH), jnp.float32)

    # deterministic edge_index (src -> dst); SAGEConv does NOT add self-loops.
    nodes = jnp.arange(N)
    src = jnp.concatenate([(nodes + 1) % N, (nodes + 5) % N, (nodes + 13) % N])
    dst = jnp.concatenate([nodes, nodes, nodes])
    adj = jnp.zeros((N, N), jnp.float32).at[dst, src].set(1.0)   # adj[dst, src]

    params = init_graphsage_params(kp, IN_CH, HIDDEN, OUT_CH, LAYERS)

    out = graphsage_forward(x, adj, params,
                            gnn_act=GNN_ACT, out_channels=OUT_CH)
    out = jax.block_until_ready(out)

    assert out.shape == (N, OUT_CH), out.shape
    assert bool(jnp.all(jnp.isfinite(out)))
    print("KERNEL_OK")
</pallas_src>

<mosaic_0001>
module attributes {stable_mosaic.version = 11 : i64} {
  func.func @kernel(%arg0: memref<128x128xf32, #tpu.memory_space<vmem>>, %arg1: memref<128x128xbf16, #tpu.memory_space<vmem>>, %arg2: memref<3x128x128xbf16, #tpu.memory_space<vmem>>, %arg3: memref<3x256x128xbf16, #tpu.memory_space<vmem>>, %arg4: memref<3x2x128xf32, #tpu.memory_space<vmem>>, %arg5: memref<128x128xf32, #tpu.memory_space<vmem>>) attributes {dimension_semantics = [], scalar_prefetch = 0 : i64, scratch_operands = 0 : i64, tpu.core_type = #tpu.core_type<tc>} {
    %c0 = arith.constant 0 : index
    %c0_0 = arith.constant 0 : index
    %0 = vector.load %arg1[%c0, %c0_0] : memref<128x128xbf16, #tpu.memory_space<vmem>>, vector<128x128xbf16>
    %c0_1 = arith.constant 0 : index
    %c0_2 = arith.constant 0 : index
    %c0_3 = arith.constant 0 : index
    %1 = vector.load %arg4[%c0_1, %c0_2, %c0_3] : memref<3x2x128xf32, #tpu.memory_space<vmem>>, vector<3x2x128xf32>
    %c0_4 = arith.constant 0 : index
    %c0_5 = arith.constant 0 : index
    %2 = vector.load %arg0[%c0_4, %c0_5] : memref<128x128xf32, #tpu.memory_space<vmem>>, vector<128x128xf32>
    %3 = arith.truncf %2 : vector<128x128xf32> to vector<128x128xbf16>
    %c0_6 = arith.constant 0 : index
    %c0_7 = arith.constant 0 : index
    %c0_8 = arith.constant 0 : index
    %4 = vector.load %arg2[%c0_6, %c0_7, %c0_8] : memref<3x128x128xbf16, #tpu.memory_space<vmem>>, vector<1x128x128xbf16>
    %5 = vector.shape_cast %4 : vector<1x128x128xbf16> to vector<128x128xbf16>
    %cst = arith.constant dense<0.000000e+00> : vector<128x128xf32>
    %6 = tpu.matmul %3, %5, %cst {dimension_numbers = #tpu.dot_dimension_numbers<[1], [0], [0], [1], [0, 0, 1, 1], [], []>} : vector<128x128xbf16>, vector<128x128xbf16>, vector<128x128xf32> -> vector<128x128xf32>
    %7 = vector.extract_strided_slice %1 {offsets = [0, 0, 0], sizes = [1, 1, 128], strides = [1, 1, 1]} : vector<3x2x128xf32> to vector<1x1x128xf32>
    %8 = vector.shape_cast %7 : vector<1x1x128xf32> to vector<128xf32>
    %9 = vector.shape_cast %8 : vector<128xf32> to vector<1x128xf32>
    %10 = vector.broadcast %9 : vector<1x128xf32> to vector<128x128xf32>
    %11 = arith.addf %6, %10 : vector<128x128xf32>
    %cst_9 = arith.constant 0.000000e+00 : f32
    %12 = vector.broadcast %cst_9 : f32 to vector<128x128xf32>
    %13 = arith.maximumf %11, %12 : vector<128x128xf32>
    %14 = arith.truncf %13 : vector<128x128xf32> to vector<128x128xbf16>
    %cst_10 = arith.constant dense<0.000000e+00> : vector<128x128xf32>
    %15 = tpu.matmul %0, %14, %cst_10 {dimension_numbers = #tpu.dot_dimension_numbers<[1], [0], [0], [1], [0, 0, 1, 1], [], []>} : vector<128x128xbf16>, vector<128x128xbf16>, vector<128x128xf32> -> vector<128x128xf32>
    %16 = arith.truncf %15 : vector<128x128xf32> to vector<128x128xbf16>
    %17 = tpu.concatenate %16, %3 in 1 : vector<128x128xbf16>, vector<128x128xbf16> -> vector<128x256xbf16>
    %c0_11 = arith.constant 0 : index
    %c0_12 = arith.constant 0 : index
    %c0_13 = arith.constant 0 : index
    %18 = vector.load %arg3[%c0_11, %c0_12, %c0_13] : memref<3x256x128xbf16, #tpu.memory_space<vmem>>, vector<1x256x128xbf16>
    %19 = vector.shape_cast %18 : vector<1x256x128xbf16> to vector<256x128xbf16>
    %cst_14 = arith.constant dense<0.000000e+00> : vector<128x128xf32>
    %20 = tpu.matmul %17, %19, %cst_14 {dimension_numbers = #tpu.dot_dimension_numbers<[1], [0], [0], [1], [0, 0, 1, 1], [], []>} : vector<128x256xbf16>, vector<256x128xbf16>, vector<128x128xf32> -> vector<128x128xf32>
    %21 = vector.extract_strided_slice %1 {offsets = [0, 1, 0], sizes = [1, 1, 128], strides = [1, 1, 1]} : vector<3x2x128xf32> to vector<1x1x128xf32>
    %22 = vector.shape_cast %21 : vector<1x1x128xf32> to vector<128xf32>
    %23 = vector.shape_cast %22 : vector<128xf32> to vector<1x128xf32>
    %24 = vector.broadcast %23 : vector<1x128xf32> to vector<128x128xf32>
    %25 = arith.addf %20, %24 : vector<128x128xf32>
    %cst_15 = arith.constant 0.000000e+00 : f32
    %26 = vector.broadcast %cst_15 : f32 to vector<128x128xf32>
    %27 = arith.cmpf ogt, %25, %26 : vector<128x128xf32>
    %cst_16 = arith.constant 0.000000e+00 : f32
    %28 = vector.broadcast %cst_16 : f32 to vector<128x128xf32>
    %29 = arith.minimumf %25, %28 : vector<128x128xf32>
    %30 = math.exp %29 : vector<128x128xf32>
    %cst_17 = arith.constant 1.000000e+00 : f32
    %31 = vector.broadcast %cst_17 : f32 to vector<128x128xf32>
    %32 = arith.subf %30, %31 : vector<128x128xf32>
    %33 = arith.select %27, %25, %32 : vector<128x128xi1>, vector<128x128xf32>
    %34 = arith.truncf %33 : vector<128x128xf32> to vector<128x128xbf16>
    %c1 = arith.constant 1 : index
    %c0_18 = arith.constant 0 : index
    %c0_19 = arith.constant 0 : index
    %35 = vector.load %arg2[%c1, %c0_18, %c0_19] : memref<3x128x128xbf16, #tpu.memory_space<vmem>>, vector<1x128x128xbf16>
    %36 = vector.shape_cast %35 : vector<1x128x128xbf16> to vector<128x128xbf16>
    %cst_20 = arith.constant dense<0.000000e+00> : vector<128x128xf32>
    %37 = tpu.matmul %34, %36, %cst_20 {dimension_numbers = #tpu.dot_dimension_numbers<[1], [0], [0], [1], [0, 0, 1, 1], [], []>} : vector<128x128xbf16>, vector<128x128xbf16>, vector<128x128xf32> -> vector<128x128xf32>
    %38 = vector.extract_strided_slice %1 {offsets = [1, 0, 0], sizes = [1, 1, 128], strides = [1, 1, 1]} : vector<3x2x128xf32> to vector<1x1x128xf32>
    %39 = vector.shape_cast %38 : vector<1x1x128xf32> to vector<128xf32>
    %40 = vector.shape_cast %39 : vector<128xf32> to vector<1x128xf32>
    %41 = vector.broadcast %40 : vector<1x128xf32> to vector<128x128xf32>
    %42 = arith.addf %37, %41 : vector<128x128xf32>
    %cst_21 = arith.constant 0.000000e+00 : f32
    %43 = vector.broadcast %cst_21 : f32 to vector<128x128xf32>
    %44 = arith.maximumf %42, %43 : vector<128x128xf32>
    %45 = arith.truncf %44 : vector<128x128xf32> to vector<128x128xbf16>
    %cst_22 = arith.constant dense<0.000000e+00> : vector<128x128xf32>
    %46 = tpu.matmul %0, %45, %cst_22 {dimension_numbers = #tpu.dot_dimension_numbers<[1], [0], [0], [1], [0, 0, 1, 1], [], []>} : vector<128x128xbf16>, vector<128x128xbf16>, vector<128x128xf32> -> vector<128x128xf32>
    %47 = arith.truncf %46 : vector<128x128xf32> to vector<128x128xbf16>
    %48 = tpu.concatenate %47, %34 in 1 : vector<128x128xbf16>, vector<128x128xbf16> -> vector<128x256xbf16>
    %c1_23 = arith.constant 1 : index
    %c0_24 = arith.constant 0 : index
    %c0_25 = arith.constant 0 : index
    %49 = vector.load %arg3[%c1_23, %c0_24, %c0_25] : memref<3x256x128xbf16, #tpu.memory_space<vmem>>, vector<1x256x128xbf16>
    %50 = vector.shape_cast %49 : vector<1x256x128xbf16> to vector<256x128xbf16>
    %cst_26 = arith.constant dense<0.000000e+00> : vector<128x128xf32>
    %51 = tpu.matmul %48, %50, %cst_26 {dimension_numbers = #tpu.dot_dimension_numbers<[1], [0], [0], [1], [0, 0, 1, 1], [], []>} : vector<128x256xbf16>, vector<256x128xbf16>, vector<128x128xf32> -> vector<128x128xf32>
    %52 = vector.extract_strided_slice %1 {offsets = [1, 1, 0], sizes = [1, 1, 128], strides = [1, 1, 1]} : vector<3x2x128xf32> to vector<1x1x128xf32>
    %53 = vector.shape_cast %52 : vector<1x1x128xf32> to vector<128xf32>
    %54 = vector.shape_cast %53 : vector<128xf32> to vector<1x128xf32>
    %55 = vector.broadcast %54 : vector<1x128xf32> to vector<128x128xf32>
    %56 = arith.addf %51, %55 : vector<128x128xf32>
    %cst_27 = arith.constant 0.000000e+00 : f32
    %57 = vector.broadcast %cst_27 : f32 to vector<128x128xf32>
    %58 = arith.cmpf ogt, %56, %57 : vector<128x128xf32>
    %cst_28 = arith.constant 0.000000e+00 : f32
    %59 = vector.broadcast %cst_28 : f32 to vector<128x128xf32>
    %60 = arith.minimumf %56, %59 : vector<128x128xf32>
    %61 = math.exp %60 : vector<128x128xf32>
    %cst_29 = arith.constant 1.000000e+00 : f32
    %62 = vector.broadcast %cst_29 : f32 to vector<128x128xf32>
    %63 = arith.subf %61, %62 : vector<128x128xf32>
    %64 = arith.select %58, %56, %63 : vector<128x128xi1>, vector<128x128xf32>
    %65 = arith.truncf %64 : vector<128x128xf32> to vector<128x128xbf16>
    %c2 = arith.constant 2 : index
    %c0_30 = arith.constant 0 : index
    %c0_31 = arith.constant 0 : index
    %66 = vector.load %arg2[%c2, %c0_30, %c0_31] : memref<3x128x128xbf16, #tpu.memory_space<vmem>>, vector<1x128x128xbf16>
    %67 = vector.shape_cast %66 : vector<1x128x128xbf16> to vector<128x128xbf16>
    %cst_32 = arith.constant dense<0.000000e+00> : vector<128x128xf32>
    %68 = tpu.matmul %65, %67, %cst_32 {dimension_numbers = #tpu.dot_dimension_numbers<[1], [0], [0], [1], [0, 0, 1, 1], [], []>} : vector<128x128xbf16>, vector<128x128xbf16>, vector<128x128xf32> -> vector<128x128xf32>
    %69 = vector.extract_strided_slice %1 {offsets = [2, 0, 0], sizes = [1, 1, 128], strides = [1, 1, 1]} : vector<3x2x128xf32> to vector<1x1x128xf32>
    %70 = vector.shape_cast %69 : vector<1x1x128xf32> to vector<128xf32>
    %71 = vector.shape_cast %70 : vector<128xf32> to vector<1x128xf32>
    %72 = vector.broadcast %71 : vector<1x128xf32> to vector<128x128xf32>
    %73 = arith.addf %68, %72 : vector<128x128xf32>
    %cst_33 = arith.constant 0.000000e+00 : f32
    %74 = vector.broadcast %cst_33 : f32 to vector<128x128xf32>
    %75 = arith.maximumf %73, %74 : vector<128x128xf32>
    %76 = arith.truncf %75 : vector<128x128xf32> to vector<128x128xbf16>
    %cst_34 = arith.constant dense<0.000000e+00> : vector<128x128xf32>
    %77 = tpu.matmul %0, %76, %cst_34 {dimension_numbers = #tpu.dot_dimension_numbers<[1], [0], [0], [1], [0, 0, 1, 1], [], []>} : vector<128x128xbf16>, vector<128x128xbf16>, vector<128x128xf32> -> vector<128x128xf32>
    %78 = arith.truncf %77 : vector<128x128xf32> to vector<128x128xbf16>
    %79 = tpu.concatenate %78, %65 in 1 : vector<128x128xbf16>, vector<128x128xbf16> -> vector<128x256xbf16>
    %c2_35 = arith.constant 2 : index
    %c0_36 = arith.constant 0 : index
    %c0_37 = arith.constant 0 : index
    %80 = vector.load %arg3[%c2_35, %c0_36, %c0_37] : memref<3x256x128xbf16, #tpu.memory_space<vmem>>, vector<1x256x128xbf16>
    %81 = vector.shape_cast %80 : vector<1x256x128xbf16> to vector<256x128xbf16>
    %cst_38 = arith.constant dense<0.000000e+00> : vector<128x128xf32>
    %82 = tpu.matmul %79, %81, %cst_38 {dimension_numbers = #tpu.dot_dimension_numbers<[1], [0], [0], [1], [0, 0, 1, 1], [], []>} : vector<128x256xbf16>, vector<256x128xbf16>, vector<128x128xf32> -> vector<128x128xf32>
    %83 = vector.extract_strided_slice %1 {offsets = [2, 1, 0], sizes = [1, 1, 128], strides = [1, 1, 1]} : vector<3x2x128xf32> to vector<1x1x128xf32>
    %84 = vector.shape_cast %83 : vector<1x1x128xf32> to vector<128xf32>
    %85 = vector.shape_cast %84 : vector<128xf32> to vector<1x128xf32>
    %86 = vector.broadcast %85 : vector<1x128xf32> to vector<128x128xf32>
    %87 = arith.addf %82, %86 : vector<128x128xf32>
    %c0_39 = arith.constant 0 : index
    %c0_40 = arith.constant 0 : index
    %88 = vector.load %arg5[%c0_39, %c0_40] : memref<128x128xf32, #tpu.memory_space<vmem>>, vector<128x128xf32>
    tpu.vector_store %arg5[%c0_39, %c0_40], %87 {strides = array<i32>} : memref<128x128xf32, #tpu.memory_space<vmem>>, vector<128x128xf32>,
    return
  }
}

</mosaic_0001>

<bundles_post_ra>
// kernel: tpu_custom_call.1
= control target key start
LH: loop header
LB: loop body
LE: loop exit
PB: predicated region body
PF: predicated region fallthrough
CT: control target
= control target key end

     0   :  { %10 = vsyncpa [#allocation3], 0  ;;  %s3204_s0 = inlined_call_operand.hbm [shape: f32[128,128], index: 0, kind: input, shape index: {}]   ;;  %s3205_s1 = inlined_call_operand.hbm [shape: bf16[128,128], index: 1, kind: input, shape index: {}]   ;;  %s3206_s2 = inlined_call_operand.hbm [shape: bf16[3,128,128], index: 2, kind: input, shape index: {}]   ;;  %s3207_s3 = inlined_call_operand.hbm [shape: bf16[3,256,128], index: 3, kind: input, shape index: {}]   ;;  %s3208_s4 = inlined_call_operand.vmem [shape: f32[3,2,128], index: 4, kind: input, shape index: {}]   ;;  %s3209_s5 = inlined_call_operand.hbm [shape: f32[128,128], index: 5, kind: output, shape index: {}]  }
   0x1   :  { %11 = vsyncpa [#allocation6], 0 }
   0x2   :  { %12 = vsyncpa [#allocation9], 0 }
   0x3   :  { %13 = vsyncpa [#allocation4], 0  ;;  %s2845_s18 = smov [#allocation5]  }
   0x4   :  { %s31_s19 = sshll.u32 %s2845_s18, 4  ;;  %s32_s19 = int_to_ptr.vmem [resolvable:$true] %s31_s19 }
   0x5   :  { %s2745_s20 = scalar_lea.vmem %s32_s19, 1024  ;;  %p2750_p1 = scmp.lt.s32.totalorder %s32_s19, %s32_s19 }
   0x6   :  { %p2746_p0 = scmp.ne.s32.totalorder %s32_s19, %s2745_s20  ;;  %p2751_p2 = scmp.lt.s32.totalorder %s2745_s20, %s2745_s20 }
   0x8   :  { %p2752_p3 = por %p2751_p2, %p2750_p1 }
   0xa   :  { %p2753_p4 = pnand %p2752_p3, %p2746_p0 }
   0xc   :  { %2756 = shalt.err (!%p2753_p4)
}
   0xd   :  { %s2846_s21 = smov 64   ;;  %s2847_s22 = smov 4  }
   0xe   :  { %37 = dma.hbm_to_vmem [thread:$0]  %s3205_s1, 1024, %s32_s19, [#allocation6], %s2846_s21, %s2846_s21, %s2847_s22  }
   0xf   :  { %s2848_s25 = smov [#allocation2]  }
  0x10   :  { %s19_s26 = sshll.u32 %s2848_s25, 4  ;;  %s20_s26 = int_to_ptr.vmem [resolvable:$true] %s19_s26 }
  0x11   :  { %s2765_s27 = scalar_lea.vmem %s20_s26, 2048  ;;  %p2770_p6 = scmp.lt.s32.totalorder %s20_s26, %s20_s26 }
  0x12   :  { %p2766_p5 = scmp.ne.s32.totalorder %s20_s26, %s2765_s27  ;;  %p2771_p7 = scmp.lt.s32.totalorder %s2765_s27, %s2765_s27 }
  0x14   :  { %p2772_p8 = por %p2771_p7, %p2770_p6 }
  0x16   :  { %p2773_p9 = pnand %p2772_p8, %p2766_p5 }
  0x18   :  { %2776 = shalt.err (!%p2773_p9)
}
  0x19   :  { %s2849_s28 = smov 128   ;;  %s2850_s29 = smov 8  }
  0x1a   :  { %25 = dma.hbm_to_vmem [thread:$0]  %s3204_s0, 2048, %s20_s26, [#allocation3], %s2849_s28, %s2849_s28, %s2850_s29  }
  0x1b   :  { %s2851_s1 = smov [#allocation7]   ;;  %s2852_s8 = smov [#allocation8]  }
  0x1c   :  { %s43_s7 = sshll.u32 %s2851_s1, 4  ;;  %s55_s9 = sshll.u32 %s2852_s8, 4  ;;  %s44_s7 = int_to_ptr.vmem [resolvable:$true] %s43_s7  ;;  %s56_s9 = int_to_ptr.vmem [resolvable:$true] %s55_s9 }
  0x1d   :  { %s2785_s10 = scalar_lea.vmem %s44_s7, 3072  ;;  %p2790_p11 = scmp.lt.s32.totalorder %s44_s7, %s44_s7 }
  0x1e   :  { %p2786_p10 = scmp.ne.s32.totalorder %s44_s7, %s2785_s10  ;;  %p2791_p12 = scmp.lt.s32.totalorder %s2785_s10, %s2785_s10 }
  0x20   :  { %p2792_p13 = por %p2791_p12, %p2790_p11 }
  0x22   :  { %p2793_p0 = pnand %p2792_p13, %p2786_p10 }
  0x24   :  { %2796 = shalt.err (!%p2793_p0)
}
  0x25   :  { %49 = dma.hbm_to_vmem [thread:$0]  %s3206_s2, 3072, %s44_s7, [#allocation6], %s2846_s21, %s2846_s21, %s2847_s22  }
  0x26   :  { %s2805_s0 = scalar_lea.vmem %s56_s9, 6144  ;;  %p2810_p2 = scmp.lt.s32.totalorder %s56_s9, %s56_s9 }
  0x27   :  { %p2806_p1 = scmp.ne.s32.totalorder %s56_s9, %s2805_s0  ;;  %p2811_p3 = scmp.lt.s32.totalorder %s2805_s0, %s2805_s0 }
  0x29   :  { %p2812_p4 = por %p2811_p3, %p2810_p2 }
  0x2b   :  { %p2813_p5 = pnand %p2812_p4, %p2806_p1 }
  0x2d   :  { %2816 = shalt.err (!%p2813_p5)
}
  0x2e   :  { %61 = dma.hbm_to_vmem [thread:$0]  %s3207_s3, 6144, %s56_s9, [#allocation9], %s2846_s21, %s2846_s21, %s2847_s22  }
  0x2f   :  { %2837 = dma.done.wait [#allocation3], 2048  }
  0x30   :  { %2838 = vsyncadd [#allocation3], 4294965248 }
  0x31   :  { %2839 = dma.done.wait [#allocation6], 4096  }
  0x32   :  { %2840 = vsyncadd [#allocation6], 4294963200 }
  0x33   :  { %2841 = dma.done.wait [#allocation9], 6144  }
  0x34   :  { %2842 = vsyncadd [#allocation9], 4294961152  ;;  %v2585_v0 = vld [vmem:[#allocation7 + $0x38] sm:$0xff]   ;;  %v2586_v1 = vld [vmem:[#allocation7 + $0x30] sm:$0xff]   ;;  %v136_v52 = vlaneseq }
  0x35   :  { %2384 = vmatprep.subr.bf16.mxu1 %v2585_v0  ;;  %v2587_v2 = vld [vmem:[#allocation7 + $0x28] sm:$0xff]   ;;  %v2588_v3 = vld [vmem:[#allocation7 + $0x20] sm:$0xff]   ;;  %v2589_v7 = vld [vmem:[#allocation7 + $0x18] sm:$0xff]  }
  0x36   :  { %2385 = vmatpush3.bf16.msra.mxu1 %v2585_v0  ;;  %v96_v4 = vld [vmem:[#allocation2] sm:$0xff]  ;;  %v97_v5 = vld [vmem:[#allocation2 + $0x8] sm:$0xff]  ;;  %v2590_v8 = vld [vmem:[#allocation7 + $0x10] sm:$0xff]   ;;  %v2934_v55 = vshrl.u32 %v136_v52, 7 }
  0x37   :  { %2386 = vmatprep.subr.bf16.mxu1 %v2586_v1  ;;  %v112_v6 = vpack.c.bf16 %v97_v5, %v96_v4  ;;  %v2591_v9 = vld [vmem:[#allocation7 + $0x8] sm:$0xff]   ;;  %v2592_v10 = vld [vmem:[#allocation7] sm:$0xff]   ;;  %v98_v11 = vld [vmem:[#allocation2 + $0x10] sm:$0xff] }
  0x38   :  { %v99_v12 = vld [vmem:[#allocation2 + $0x18] sm:$0xff]  ;;  %v100_v13 = vld [vmem:[#allocation2 + $0x20] sm:$0xff]  ;;  %v101_v14 = vld [vmem:[#allocation2 + $0x28] sm:$0xff]  ;;  %v2937_v58 = vsub.s32 0, %v2934_v55 }
  0x39   :  { %2400 = vmatprep.mubr.bf16.mxu1 %v112_v6  ;;  %626 = vmatprep.mubr.bf16.mxu0 %v112_v6  ;;  %v2908_v15 = vpack.c.bf16 %v99_v12, %v98_v11  ;;  %v2910_v16 = vpack.c.bf16 %v101_v14, %v100_v13  ;;  %v102_v17 = vld [vmem:[#allocation2 + $0x30] sm:$0xff]  ;;  %v103_v18 = vld [vmem:[#allocation2 + $0x38] sm:$0xff]  ;;  %v104_v19 = vld [vmem:[#allocation2 + $0x40] sm:$0xff] }
  0x3a   :  { %2387 = vmatpush3.bf16.msra.mxu1 %v2586_v1  ;;  %v105_v20 = vld [vmem:[#allocation2 + $0x48] sm:$0xff]  ;;  %v2914_v21 = vpack.c.bf16 %v103_v18, %v102_v17  ;;  %v106_v23 = vld [vmem:[#allocation2 + $0x50] sm:$0xff]  ;;  %v107_v24 = vld [vmem:[#allocation2 + $0x58] sm:$0xff] }
  0x3b   :  { %2388 = vmatprep.subr.bf16.mxu1 %v2587_v2  ;;  %v2916_v22 = vpack.c.bf16 %v105_v20, %v104_v19  ;;  %v108_v25 = vld [vmem:[#allocation2 + $0x60] sm:$0xff]  ;;  %v109_v26 = vld [vmem:[#allocation2 + $0x68] sm:$0xff]  ;;  %v2920_v27 = vpack.c.bf16 %v107_v24, %v106_v23  ;;  %v110_v29 = vld [vmem:[#allocation2 + $0x70] sm:$0xff] }
  0x3c   :  { %v2922_v28 = vpack.c.bf16 %v109_v26, %v108_v25  ;;  %v111_v30 = vld [vmem:[#allocation2 + $0x78] sm:$0xff]  ;;  %v2929_v32 = vld [vmem:[#allocation5] sm:$0xff]   ;;  %v2603_v35 = vld [vmem:[#allocation8 + $0x70] sm:$0xff]  }
  0x3d   :  { %v2926_v31 = vpack.c.bf16 %v111_v30, %v110_v29  ;;  %v2601_v33 = vld [vmem:[#allocation8 + $0x78] sm:$0xff]   ;;  %v2604_v36 = vld [vmem:[#allocation8 + $0x30] sm:$0xff]   ;;  %v2605_v37 = vld [vmem:[#allocation8 + $0x68] sm:$0xff]  }
  0x3e   :  { %2389 = vmatpush3.bf16.msra.mxu1 %v2587_v2  ;;  %v2602_v34 = vld [vmem:[#allocation8 + $0x38] sm:$0xff]   ;;  %2128 = vmatprep.subr.bf16.mxu0 %v2601_v33  ;;  %v2606_v38 = vld [vmem:[#allocation8 + $0x28] sm:$0xff]   ;;  %v2607_v39 = vld [vmem:[#allocation8 + $0x60] sm:$0xff]  }
  0x3f   :  { %2390 = vmatprep.subr.bf16.mxu1 %v2588_v3  ;;  %2129 = vmatpush3.bf16.msra.mxu0 %v2602_v34  ;;  %v2608_v40 = vld [vmem:[#allocation8 + $0x20] sm:$0xff]   ;;  %v2609_v41 = vld [vmem:[#allocation8 + $0x58] sm:$0xff]   ;;  %v2611_v43 = vld [vmem:[#allocation8 + $0x50] sm:$0xff]  }
  0x40   :  { %2130 = vmatprep.subr.bf16.mxu0 %v2603_v35  ;;  %v2610_v42 = vld [vmem:[#allocation8 + $0x18] sm:$0xff]   ;;  %v2612_v44 = vld [vmem:[#allocation8 + $0x10] sm:$0xff]   ;;  %v2942_v59 = vld [vmem:[%s3208_s4] sm:$0x3] }
  0x41   :  { %v139_v62 = vrot.slane %v2942_v59, %v2937_v58 }
  0x42   :  { %2391 = vmatpush3.bf16.msra.mxu1 %v2588_v3 }
  0x43   :  { %2392 = vmatprep.subr.bf16.mxu1 %v2589_v7  ;;  %2131 = vmatpush3.bf16.msra.mxu0 %v2604_v36 }
  0x44   :  { %2132 = vmatprep.subr.bf16.mxu0 %v2605_v37 }
  0x46   :  { %2393 = vmatpush3.bf16.msra.mxu1 %v2589_v7 }
  0x47   :  { %2394 = vmatprep.subr.bf16.mxu1 %v2590_v8  ;;  %2133 = vmatpush3.bf16.msra.mxu0 %v2606_v38 }
  0x48   :  { %2134 = vmatprep.subr.bf16.mxu0 %v2607_v39 }
  0x4a   :  { %2395 = vmatpush3.bf16.msra.mxu1 %v2590_v8 }
  0x4b   :  { %2396 = vmatprep.subr.bf16.mxu1 %v2591_v9  ;;  %2135 = vmatpush3.bf16.msra.mxu0 %v2608_v40 }
  0x4c   :  { %2136 = vmatprep.subr.bf16.mxu0 %v2609_v41 }
  0x4e   :  { %2397 = vmatpush3.bf16.msra.mxu1 %v2591_v9 }
  0x4f   :  { %2398 = vmatprep.subr.bf16.mxu1 %v2592_v10  ;;  %2137 = vmatpush3.bf16.msra.mxu0 %v2610_v42 }
  0x50   :  { %2138 = vmatprep.subr.bf16.mxu0 %v2611_v43 }
  0x52   :  { %2399 = vmatpush3.bf16.msra.mxu1 %v2592_v10 }
  0x53   :  { %2139 = vmatpush3.bf16.msra.mxu0 %v2612_v44 }
  0x55   :  { %2401 = vmatmul.mubr.bf16.vlgmr.msra.gmra.mxu1 %v2908_v15 }
  0x56   :  { %2404 = vmatprep.mubr.bf16.mxu1 %v2910_v16 }
  0x5d   :  { %2405 = vmatmul.mubr.bf16.gmra.mxu1 %v2914_v21 }
  0x5e   :  { %2408 = vmatprep.mubr.bf16.mxu1 %v2916_v22 }
  0x65   :  { %2409 = vmatmul.mubr.bf16.gmra.mxu1 %v2920_v27 }
  0x66   :  { %2412 = vmatprep.mubr.bf16.mxu1 %v2922_v28 }
  0x6d   :  { %2413 = vmatmul.mubr.bf16.gmra.mxu1 %v2926_v31 }
  0x6e   :  { %2432 = vmatprep.mubr.bf16.mxu1 %v2929_v32 }
 0x115   :  { %v2402_v45 = vpop.f32.mrf.mxu1 }
 0x116   :  { %v231_v39 = vadd.f32 %v2402_v45, %v139_v62  ;;  %v2949_v45 = vld [vmem:[#allocation5 + $0x10] sm:$0xff]  }
 0x117   :  { %v2932_v46 = vpop.f32.mrf.mxu1 }
 0x118   :  { %v287_v44 = vmax.f32 %v231_v39, 0.0 }
 0x119   :  { %v2403_v47 = vpop.f32.mrf.mxu1 }
 0x11a   :  { %v234_v36 = vadd.f32 %v2403_v47, %v139_v62 }
 0x11b   :  { %v225_v48 = vpop.f32.mrf.mxu1 }
 0x11c   :  { %v288_v41 = vmax.f32 %v234_v36, 0.0  ;;  %v226_v42 = vadd.f32 %v225_v48, %v139_v62  ;;  %v2953_v48 = vld [vmem:[#allocation5 + $0x18] sm:$0xff]  }
 0x11d   :  { %v2406_v49 = vpop.f32.mrf.mxu1 }
 0x11e   :  { %v247_v25 = vadd.f32 %v2406_v49, %v139_v62  ;;  %v223_v49 = vadd.f32 %v2932_v46, %v139_v62  ;;  %v286_v52 = vmax.f32 %v226_v42, 0.0  ;;  %v2955_v46 = vld [vmem:[#allocation5 + $0x20] sm:$0xff]  }
 0x11f   :  { %v238_v50 = vpop.f32.mrf.mxu1 }
 0x120   :  { %v291_v34 = vmax.f32 %v247_v25, 0.0  ;;  %v239_v35 = vadd.f32 %v238_v50, %v139_v62  ;;  %v285_v50 = vmax.f32 %v223_v49, 0.0  ;;  %v2618_v25 = vld [vmem:[#allocation7 + $0x70] sm:$0xff]  }
 0x121   :  { %v2407_v51 = vpop.f32.mrf.mxu1 }
 0x122   :  { %v250_v20 = vadd.f32 %v2407_v51, %v139_v62  ;;  %v289_v40 = vmax.f32 %v239_v35, 0.0  ;;  %v302_v51 = vpack.c.bf16 %v288_v41, %v287_v44  ;;  %v301_v47 = vpack.c.bf16 %v286_v52, %v285_v50 }
 0x123   :  { %v241_v53 = vpop.f32.mrf.mxu1 }
 0x124   :  { %v292_v29 = vmax.f32 %v250_v20, 0.0  ;;  %v242_v30 = vadd.f32 %v241_v53, %v139_v62  ;;  %v2947_v53 = vld [vmem:[#allocation5 + $0x8] sm:$0xff]  }
 0x125   :  { %v2410_v54 = vpop.f32.mrf.mxu1 }
 0x126   :  { %v263_v9 = vadd.f32 %v2410_v54, %v139_v62  ;;  %v304_v37 = vpack.c.bf16 %v292_v29, %v291_v34  ;;  %v290_v38 = vmax.f32 %v242_v30, 0.0  ;;  %v2959_v54 = vld [vmem:[#allocation5 + $0x28] sm:$0xff]   ;;  %v2622_v29 = vld [vmem:[#allocation7 + $0x50] sm:$0xff]   ;;  %v2624_v30 = vld [vmem:[#allocation7 + $0x40] sm:$0xff]  }
 0x127   :  { %v254_v56 = vpop.f32.mrf.mxu1 }
 0x128   :  { %v295_v18 = vmax.f32 %v263_v9, 0.0  ;;  %v255_v19 = vadd.f32 %v254_v56, %v139_v62  ;;  %v303_v43 = vpack.c.bf16 %v290_v38, %v289_v40  ;;  %v2961_v56 = vld [vmem:[#allocation5 + $0x30] sm:$0xff]  }
 0x129   :  { %v2411_v57 = vpop.f32.mrf.mxu1 }
 0x12a   :  { %v266_v5 = vadd.f32 %v2411_v57, %v139_v62  ;;  %v293_v26 = vmax.f32 %v255_v19, 0.0  ;;  %v2965_v57 = vld [vmem:[#allocation5 + $0x38] sm:$0xff]  }
 0x12b   :  { %v257_v60 = vpop.f32.mrf.mxu1 }
 0x12c   :  { %v296_v13 = vmax.f32 %v266_v5, 0.0  ;;  %v258_v14 = vadd.f32 %v257_v60, %v139_v62  ;;  %v2613_v60 = vld [vmem:[#allocation8 + $0x48] sm:$0xff]  }
 0x12d   :  { %v2414_v61 = vpop.f32.mrf.mxu1  ;;  %2140 = vmatprep.subr.bf16.mxu0 %v2613_v60 }
 0x12e   :  { %v279_v0 = vadd.f32 %v2414_v61, %v139_v62  ;;  %v306_v23 = vpack.c.bf16 %v296_v13, %v295_v18  ;;  %v294_v24 = vmax.f32 %v258_v14, 0.0  ;;  %v2614_v61 = vld [vmem:[#allocation8 + $0x8] sm:$0xff]  }
 0x12f   :  { %v270_v63 = vpop.f32.mrf.mxu1  ;;  %2141 = vmatpush3.bf16.msra.mxu0 %v2614_v61 }
 0x130   :  { %v271_v2 = vadd.f32 %v270_v63, %v139_v62  ;;  %v299_v6 = vmax.f32 %v279_v0, 0.0  ;;  %v305_v33 = vpack.c.bf16 %v294_v24, %v293_v26  ;;  %v2616_v63 = vld [vmem:[#allocation8] sm:$0xff]  }
 0x131   :  { %v2415_v1 = vpop.f32.mrf.mxu1  ;;  %v2620_v26 = vld [vmem:[#allocation7 + $0x60] sm:$0xff]  }
 0x132   :  { %v282_v3 = vadd.f32 %v2415_v1, %v139_v62  ;;  %v297_v10 = vmax.f32 %v271_v2, 0.0 }
 0x133   :  { %v273_v4 = vpop.f32.mrf.mxu1 }
 0x134   :  { %v300_v7 = vmax.f32 %v282_v3, 0.0  ;;  %v274_v8 = vadd.f32 %v273_v4, %v139_v62  ;;  %v2615_v62 = vld [vmem:[#allocation8 + $0x40] sm:$0xff]  }
 0x135   :  { %2142 = vmatprep.subr.bf16.mxu0 %v2615_v62 }
 0x136   :  { %v308_v11 = vpack.c.bf16 %v300_v7, %v299_v6  ;;  %v298_v12 = vmax.f32 %v274_v8, 0.0  ;;  %2143 = vmatpush3.bf16.msra.mxu0 %v2616_v63 }
 0x138   :  { %v307_v17 = vpack.c.bf16 %v298_v12, %v297_v10  ;;  %2416 = vmatprep.subr.bf16.mxu1 %v308_v11 }
 0x139   :  { %2417 = vmatpush3.bf16.msra.mxu1 %v308_v11 }
 0x13a   :  { %2418 = vmatprep.subr.bf16.mxu1 %v307_v17 }
 0x13d   :  { %2419 = vmatpush3.bf16.msra.mxu1 %v307_v17 }
 0x13e   :  { %2420 = vmatprep.subr.bf16.mxu1 %v306_v23 }
 0x141   :  { %2421 = vmatpush3.bf16.msra.mxu1 %v306_v23 }
 0x142   :  { %2422 = vmatprep.subr.bf16.mxu1 %v305_v33 }
 0x145   :  { %2423 = vmatpush3.bf16.msra.mxu1 %v305_v33  ;;  %v2976_v33 = vsub.s32 1, %v2934_v55 }
 0x146   :  { %2424 = vmatprep.subr.bf16.mxu1 %v304_v37 }
 0x147   :  { %v2980_v35 = vrot.slane %v2942_v59, %v2976_v33 }
 0x149   :  { %2425 = vmatpush3.bf16.msra.mxu1 %v304_v37 }
 0x14a   :  { %2426 = vmatprep.subr.bf16.mxu1 %v303_v43 }
 0x14d   :  { %2427 = vmatpush3.bf16.msra.mxu1 %v303_v43 }
 0x14e   :  { %2428 = vmatprep.subr.bf16.mxu1 %v302_v51 }
 0x151   :  { %2429 = vmatpush3.bf16.msra.mxu1 %v302_v51 }
 0x152   :  { %2430 = vmatprep.subr.bf16.mxu1 %v301_v47 }
 0x155   :  { %2431 = vmatpush3.bf16.msra.mxu1 %v301_v47 }
 0x158   :  { %2433 = vmatmul.mubr.bf16.vlgmr.msra.gmra.mxu1 %v2947_v53 }
 0x159   :  { %2436 = vmatprep.mubr.bf16.mxu1 %v2949_v45 }
 0x160   :  { %2437 = vmatmul.mubr.bf16.gmra.mxu1 %v2953_v48 }
 0x161   :  { %2440 = vmatprep.mubr.bf16.mxu1 %v2955_v46 }
 0x168   :  { %2441 = vmatmul.mubr.bf16.gmra.mxu1 %v2959_v54 }
 0x169   :  { %2444 = vmatprep.mubr.bf16.mxu1 %v2961_v56 }
 0x170   :  { %2445 = vmatmul.mubr.bf16.gmra.mxu1 %v2965_v57 }
 0x218   :  { %v2434_v0 = vpop.f32.mrf.mxu1 }
 0x21a   :  { %v391_v1 = vpop.f32.mrf.mxu1 }
 0x21c   :  { %v2435_v2 = vpop.f32.mrf.mxu1 }
 0x21d   :  { %v455_v7 = vpack.c.bf16 %v2435_v2, %v2434_v0 }
 0x21e   :  { %v394_v3 = vpop.f32.mrf.mxu1 }
 0x21f   :  { %v454_v4 = vpack.c.bf16 %v394_v3, %v391_v1 }
 0x220   :  { %v2438_v5 = vpop.f32.mrf.mxu1 }
 0x221   :  { %627 = vmatmul.mubr.bf16.vlgmr.msra.gmra.mxu0 %v454_v4 }
 0x222   :  { %634 = vmatprep.mubr.bf16.mxu0 %v2908_v15  ;;  %v407_v6 = vpop.f32.mrf.mxu1 }
 0x224   :  { %v2439_v8 = vpop.f32.mrf.mxu1 }
 0x225   :  { %v457_v13 = vpack.c.bf16 %v2439_v8, %v2438_v5 }
 0x226   :  { %v410_v9 = vpop.f32.mrf.mxu1 }
 0x227   :  { %v456_v10 = vpack.c.bf16 %v410_v9, %v407_v6 }
 0x228   :  { %v2442_v11 = vpop.f32.mrf.mxu1 }
 0x229   :  { %635 = vmatmul.mubr.bf16.gmra.mxu0 %v455_v7 }
 0x22a   :  { %642 = vmatprep.mubr.bf16.mxu0 %v2910_v16  ;;  %v423_v12 = vpop.f32.mrf.mxu1 }
 0x22c   :  { %v2443_v14 = vpop.f32.mrf.mxu1 }
 0x22d   :  { %v459_v16 = vpack.c.bf16 %v2443_v14, %v2442_v11 }
 0x22e   :  { %v426_v17 = vpop.f32.mrf.mxu1 }
 0x22f   :  { %v458_v15 = vpack.c.bf16 %v426_v17, %v423_v12 }
 0x230   :  { %v2446_v18 = vpop.f32.mrf.mxu1 }
 0x231   :  { %643 = vmatmul.mubr.bf16.gmra.mxu0 %v456_v10 }
 0x232   :  { %650 = vmatprep.mubr.bf16.mxu0 %v2914_v21  ;;  %v439_v19 = vpop.f32.mrf.mxu1 }
 0x234   :  { %v2447_v20 = vpop.f32.mrf.mxu1 }
 0x235   :  { %v461_v24 = vpack.c.bf16 %v2447_v20, %v2446_v18 }
 0x236   :  { %v442_v23 = vpop.f32.mrf.mxu1 }
 0x237   :  { %v460_v21 = vpack.c.bf16 %v442_v23, %v439_v19 }
 0x239   :  { %651 = vmatmul.mubr.bf16.gmra.mxu0 %v457_v13 }
 0x23a   :  { %658 = vmatprep.mubr.bf16.mxu0 %v2916_v22  ;;  %v2617_v22 = vld [vmem:[#allocation7 + $0x78] sm:$0xff]  }
 0x23b   :  { %2448 = vmatprep.subr.bf16.mxu1 %v2617_v22 }
 0x23c   :  { %2449 = vmatpush3.bf16.msra.mxu1 %v2617_v22 }
 0x23d   :  { %2450 = vmatprep.subr.bf16.mxu1 %v2618_v25 }
 0x240   :  { %2451 = vmatpush3.bf16.msra.mxu1 %v2618_v25 }
 0x241   :  { %659 = vmatmul.mubr.bf16.gmra.mxu0 %v458_v15 }
 0x242   :  { %666 = vmatprep.mubr.bf16.mxu0 %v2920_v27  ;;  %v2619_v27 = vld [vmem:[#allocation7 + $0x68] sm:$0xff]  }
 0x243   :  { %2452 = vmatprep.subr.bf16.mxu1 %v2619_v27 }
 0x244   :  { %2453 = vmatpush3.bf16.msra.mxu1 %v2619_v27 }
 0x245   :  { %2454 = vmatprep.subr.bf16.mxu1 %v2620_v26 }
 0x248   :  { %2455 = vmatpush3.bf16.msra.mxu1 %v2620_v26 }
 0x249   :  { %667 = vmatmul.mubr.bf16.gmra.mxu0 %v459_v16 }
 0x24a   :  { %674 = vmatprep.mubr.bf16.mxu0 %v2922_v28  ;;  %v2621_v28 = vld [vmem:[#allocation7 + $0x58] sm:$0xff]  }
 0x24b   :  { %2456 = vmatprep.subr.bf16.mxu1 %v2621_v28 }
 0x24c   :  { %2457 = vmatpush3.bf16.msra.mxu1 %v2621_v28 }
 0x24d   :  { %2458 = vmatprep.subr.bf16.mxu1 %v2622_v29 }
 0x250   :  { %2459 = vmatpush3.bf16.msra.mxu1 %v2622_v29 }
 0x251   :  { %675 = vmatmul.mubr.bf16.gmra.mxu0 %v460_v21 }
 0x252   :  { %682 = vmatprep.mubr.bf16.mxu0 %v2926_v31  ;;  %v2623_v31 = vld [vmem:[#allocation7 + $0x48] sm:$0xff]  }
 0x253   :  { %2460 = vmatprep.subr.bf16.mxu1 %v2623_v31 }
 0x254   :  { %2461 = vmatpush3.bf16.msra.mxu1 %v2623_v31 }
 0x255   :  { %2462 = vmatprep.subr.bf16.mxu1 %v2624_v30 }
 0x258   :  { %2463 = vmatpush3.bf16.msra.mxu1 %v2624_v30 }
 0x259   :  { %683 = vmatmul.mubr.bf16.gmra.mxu0 %v461_v24 }
 0x2e1   :  { %v2144_v34 = vpop.f32.mrf.mxu0 }
 0x2e3   :  { %v2145_v36 = vpop.f32.mrf.mxu0 }
 0x2e4   :  { %v2146_v37 = vadd.f32 %v2145_v36, %v2144_v34 }
 0x2e5   :  { %v2147_v38 = vpop.f32.mrf.mxu0 }
 0x2e6   :  { %v629_v39 = vadd.f32 %v2146_v37, %v2980_v35 }
 0x2e7   :  { %v2148_v40 = vpop.f32.mrf.mxu0 }
 0x2e8   :  { %v707_v41 = vmin.f32 %v629_v39, 0.0  ;;  %v2149_v42 = vadd.f32 %v2148_v40, %v2147_v38  ;;  %vm691_vm0 = vcmp.gt.f32.partialorder %v629_v39, 0.0 }
 0x2e9   :  { %v2150_v43 = vpop.f32.mrf.mxu0 }
 0x2ea   :  { %v723_v44 = vmul.f32 1.442695, %v707_v41  ;;  %v632_v49 = vadd.f32 %v2149_v42, %v2980_v35 }
 0x2eb   :  { %v2151_v51 = vpop.f32.mrf.mxu0 }
 0x2ec   :  { %v708_v55 = vmin.f32 %v632_v49, 0.0  ;;  %v2152_v52 = vadd.f32 %v2151_v51, %v2150_v43  ;;  %2665 = vpow2.f32 %v723_v44  ;;  %vm692_vm1 = vcmp.gt.f32.partialorder %v632_v49, 0.0 }
 0x2ed   :  { %v2153_v50 = vpop.f32.mrf.mxu0 }
 0x2ee   :  { %v725_v47 = vmul.f32 1.442695, %v708_v55  ;;  %v637_v59 = vadd.f32 %v2152_v52, %v2980_v35 }
 0x2ef   :  { %v2154_v60 = vpop.f32.mrf.mxu0 }
 0x2f0   :  { %2667 = vpow2.f32 %v725_v47  ;;  %v709_v61 = vmin.f32 %v637_v59, 0.0  ;;  %v2155_v62 = vadd.f32 %v2154_v60, %v2153_v50  ;;  %vm693_vm2 = vcmp.gt.f32.partialorder %v637_v59, 0.0 }
 0x2f1   :  { %v2156_v63 = vpop.f32.mrf.mxu0 }
 0x2f2   :  { %v727_v0 = vmul.f32 1.442695, %v709_v61  ;;  %v640_v1 = vadd.f32 %v2155_v62, %v2980_v35 }
 0x2f3   :  { %v2157_v2 = vpop.f32.mrf.mxu0 }
 0x2f4   :  { %2669 = vpow2.f32 %v727_v0  ;;  %v710_v3 = vmin.f32 %v640_v1, 0.0  ;;  %v2158_v4 = vadd.f32 %v2157_v2, %v2156_v63  ;;  %vm694_vm3 = vcmp.gt.f32.partialorder %v640_v1, 0.0 }
 0x2f5   :  { %v2159_v5 = vpop.f32.mrf.mxu0 }
 0x2f6   :  { %v729_v6 = vmul.f32 1.442695, %v710_v3  ;;  %v2987_v7 = vadd.f32 %v2158_v4, %v2980_v35 }
 0x2f7   :  { %v2160_v8 = vpop.f32.mrf.mxu0 }
 0x2f8   :  { %2671 = vpow2.f32 %v729_v6  ;;  %v711_v9 = vmin.f32 %v2987_v7, 0.0  ;;  %v2161_v10 = vadd.f32 %v2160_v8, %v2159_v5  ;;  %vm695_vm4 = vcmp.gt.f32.partialorder %v2987_v7, 0.0 }
 0x2f9   :  { %v2162_v11 = vpop.f32.mrf.mxu0  ;;  %v2666_v12 = vpop.eup %2665 }
 0x2fa   :  { %v731_v13 = vmul.f32 1.442695, %v711_v9  ;;  %v2991_v14 = vadd.f32 %v2161_v10, %v2980_v35  ;;  %v2016_v20 = vadd.f32 -1.0, %v2666_v12 }
 0x2fb   :  { %v2163_v17 = vpop.f32.mrf.mxu0 }
 0x2fc   :  { %v712_v15 = vmin.f32 %v2991_v14, 0.0  ;;  %v2164_v18 = vadd.f32 %v2163_v17, %v2162_v11  ;;  %2673 = vpow2.f32 %v731_v13  ;;  %v771_v29 = vsel %vm691_vm0, %v629_v39, %v2016_v20 }
 0x2fd   :  { %v2668_v19 = vpop.eup %2667  ;;  %v2165_v16 = vpop.f32.mrf.mxu0  ;;  %vm696_vm5 = vcmp.gt.f32.partialorder %v2991_v14, 0.0 }
 0x2fe   :  { %v733_v23 = vmul.f32 1.442695, %v712_v15  ;;  %v2995_v21 = vadd.f32 %v2164_v18, %v2980_v35  ;;  %v2017_v24 = vadd.f32 -1.0, %v2668_v19 }
 0x2ff   :  { %v2166_v22 = vpop.f32.mrf.mxu0 }
 0x300   :  { %2675 = vpow2.f32 %v733_v23  ;;  %v713_v25 = vmin.f32 %v2995_v21, 0.0  ;;  %v2167_v27 = vadd.f32 %v2166_v22, %v2165_v16  ;;  %v772_v31 = vsel %vm692_vm1, %v632_v49, %v2017_v24 }
 0x301   :  { %v2670_v26 = vpop.eup %2669  ;;  %v2168_v28 = vpop.f32.mrf.mxu0  ;;  %v787_v36 = vpack.c.bf16 %v772_v31, %v771_v29  ;;  %vm697_vm6 = vcmp.gt.f32.partialorder %v2995_v21, 0.0 }
 0x302   :  { %v735_v30 = vmul.f32 1.442695, %v713_v25  ;;  %v2999_v34 = vadd.f32 %v2167_v27, %v2980_v35  ;;  %v2018_v38 = vadd.f32 -1.0, %v2670_v26 }
 0x303   :  { %v2169_v37 = vpop.f32.mrf.mxu0  ;;  %2464 = vmatprep.mubr.bf16.mxu1 %v787_v36  ;;  %1255 = vmatprep.mubr.bf16.mxu0 %v787_v36 }
 0x304   :  { %v714_v40 = vmin.f32 %v2999_v34, 0.0  ;;  %2677 = vpow2.f32 %v735_v30  ;;  %v2170_v42 = vadd.f32 %v2169_v37, %v2168_v28  ;;  %v773_v55 = vsel %vm693_vm2, %v637_v59, %v2018_v38 }
 0x305   :  { %v2672_v41 = vpop.eup %2671  ;;  %v2171_v43 = vpop.f32.mrf.mxu0  ;;  %vm698_vm7 = vcmp.gt.f32.partialorder %v2999_v34, 0.0 }
 0x306   :  { %v2019_v44 = vadd.f32 -1.0, %v2672_v41  ;;  %v737_v51 = vmul.f32 1.442695, %v714_v40  ;;  %v3003_v39 = vadd.f32 %v2170_v42, %v2980_v35 }
 0x307   :  { %v2172_v49 = vpop.f32.mrf.mxu0 }
 0x308   :  { %v774_v52 = vsel %vm694_vm3, %v640_v1, %v2019_v44  ;;  %2679 = vpow2.f32 %v737_v51  ;;  %v2173_v50 = vadd.f32 %v2172_v49, %v2171_v43  ;;  %v715_v60 = vmin.f32 %v3003_v39, 0.0 }
 0x309   :  { %v3005_v47 = vpack.c.bf16 %v774_v52, %v773_v55  ;;  %v2174_v61 = vpop.f32.mrf.mxu0  ;;  %v2674_v62 = vpop.eup %2673  ;;  %vm699_vm8 = vcmp.gt.f32.partialorder %v3003_v39, 0.0 }
 0x30a   :  { %v3009_v63 = vadd.f32 %v2173_v50, %v2980_v35  ;;  %v739_v0 = vmul.f32 1.442695, %v715_v60  ;;  %v2020_v5 = vadd.f32 -1.0, %v2674_v62 }
 0x30b   :  { %v2175_v2 = vpop.f32.mrf.mxu0  ;;  %2465 = vmatmul.mubr.bf16.vlgmr.msra.gmra.mxu1 %v3005_v47 }
 0x30c   :  { %v716_v3 = vmin.f32 %v3009_v63, 0.0  ;;  %v2176_v4 = vadd.f32 %v2175_v2, %v2174_v61  ;;  %2681 = vpow2.f32 %v739_v0  ;;  %v775_v17 = vsel %vm695_vm4, %v2987_v7, %v2020_v5 }
 0x30d   :  { %v2676_v59 = vpop.eup %2675  ;;  %v2177_v1 = vpop.f32.mrf.mxu0  ;;  %vm700_vm9 = vcmp.gt.f32.partialorder %v3009_v63, 0.0 }
 0x30e   :  { %v741_v6 = vmul.f32 1.442695, %v716_v3  ;;  %v3014_v8 = vadd.f32 %v2176_v4, %v2980_v35  ;;  %v2021_v9 = vadd.f32 -1.0, %v2676_v59 }
 0x30f   :  { %v2178_v10 = vpop.f32.mrf.mxu0 }
 0x310   :  { %2683 = vpow2.f32 %v741_v6  ;;  %v717_v11 = vmin.f32 %v3014_v8, 0.0  ;;  %v2179_v12 = vadd.f32 %v2178_v10, %v2177_v1  ;;  %v776_v15 = vsel %vm696_vm5, %v2991_v14, %v2021_v9 }
 0x311   :  { %v2180_v13 = vpop.f32.mrf.mxu0  ;;  %v2678_v18 = vpop.eup %2677  ;;  %v3022_v20 = vpack.c.bf16 %v776_v15, %v775_v17  ;;  %vm701_vm10 = vcmp.gt.f32.partialorder %v3014_v8, 0.0 }
 0x312   :  { %v743_v19 = vmul.f32 1.442695, %v717_v11  ;;  %v672_v16 = vadd.f32 %v2179_v12, %v2980_v35  ;;  %v2022_v26 = vadd.f32 -1.0, %v2678_v18 }
 0x313   :  { %v2181_v23 = vpop.f32.mrf.mxu0  ;;  %2468 = vmatprep.mubr.bf16.mxu1 %v3022_v20 }
 0x314   :  { %2685 = vpow2.f32 %v743_v19  ;;  %v718_v24 = vmin.f32 %v672_v16, 0.0  ;;  %v2182_v22 = vadd.f32 %v2181_v23, %v2180_v13  ;;  %v777_v37 = vsel %vm697_vm6, %v2995_v21, %v2022_v26 }
 0x315   :  { %v2680_v25 = vpop.eup %2679  ;;  %v2183_v27 = vpop.f32.mrf.mxu0  ;;  %vm702_vm11 = vcmp.gt.f32.partialorder %v672_v16, 0.0 }
 0x316   :  { %v745_v28 = vmul.f32 1.442695, %v718_v24  ;;  %v677_v7 = vadd.f32 %v2182_v22, %v2980_v35  ;;  %v2023_v29 = vadd.f32 -1.0, %v2680_v25 }
 0x317   :  { %v2184_v14 = vpop.f32.mrf.mxu0 }
 0x318   :  { %2687 = vpow2.f32 %v745_v28  ;;  %v719_v31 = vmin.f32 %v677_v7, 0.0  ;;  %v2185_v30 = vadd.f32 %v2184_v14, %v2183_v27  ;;  %v778_v38 = vsel %vm698_vm7, %v2999_v34, %v2023_v29  ;;  %v2626_v29 = vld [vmem:[#allocation8 + $0xb8] sm:$0xff]   ;;  %v2627_v14 = vld [vmem:[#allocation8 + $0xf0] sm:$0xff]  }
 0x319   :  { %v2186_v36 = vpop.f32.mrf.mxu0  ;;  %v2682_v40 = vpop.eup %2681  ;;  %v3031_v43 = vpack.c.bf16 %v778_v38, %v777_v37  ;;  %vm703_vm12 = vcmp.gt.f32.partialorder %v677_v7, 0.0  ;;  %v2631_v37 = vld [vmem:[#allocation8 + $0xe0] sm:$0xff]  }
 0x31a   :  { %v747_v41 = vmul.f32 1.442695, %v719_v31  ;;  %v680_v42 = vadd.f32 %v2185_v30, %v2980_v35  ;;  %v2024_v50 = vadd.f32 -1.0, %v2682_v40  ;;  %v2628_v31 = vld [vmem:[#allocation8 + $0xb0] sm:$0xff]   ;;  %v2629_v30 = vld [vmem:[#allocation8 + $0xe8] sm:$0xff]   ;;  %v2632_v38 = vld [vmem:[#allocation8 + $0xa0] sm:$0xff]  }
 0x31b   :  { %v2187_v44 = vpop.f32.mrf.mxu0  ;;  %2469 = vmatmul.mubr.bf16.gmra.mxu1 %v3031_v43  ;;  %v2633_v40 = vld [vmem:[#allocation8 + $0xd8] sm:$0xff]  }
 0x31c   :  { %2689 = vpow2.f32 %v747_v41  ;;  %v720_v51 = vmin.f32 %v680_v42, 0.0  ;;  %v2188_v49 = vadd.f32 %v2187_v44, %v2186_v36  ;;  %v779_v3 = vsel %vm699_vm8, %v3003_v39, %v2024_v50  ;;  %v2630_v36 = vld [vmem:[#allocation8 + $0xa8] sm:$0xff]   ;;  %v2634_v41 = vld [vmem:[#allocation8 + $0x98] sm:$0xff]   ;;  %v2636_v44 = vld [vmem:[#allocation8 + $0x90] sm:$0xff]  }
 0x31d   :  { %v2684_v55 = vpop.eup %2683  ;;  %v2189_v52 = vpop.f32.mrf.mxu0  ;;  %vm704_vm13 = vcmp.gt.f32.partialorder %v680_v42, 0.0 }
 0x31e   :  { %v749_v60 = vmul.f32 1.442695, %v720_v51  ;;  %v685_v21 = vadd.f32 %v2188_v49, %v2980_v35  ;;  %v2025_v61 = vadd.f32 -1.0, %v2684_v55  ;;  %v2637_v51 = vld [vmem:[#allocation8 + $0xc8] sm:$0xff]  }
 0x31f   :  { %v2190_v34 = vpop.f32.mrf.mxu0  ;;  %v2638_v55 = vld [vmem:[#allocation8 + $0x88] sm:$0xff]  }
 0x320   :  { %2691 = vpow2.f32 %v749_v60  ;;  %v721_v62 = vmin.f32 %v685_v21, 0.0  ;;  %v2191_v0 = vadd.f32 %v2190_v34, %v2189_v52  ;;  %v780_v4 = vsel %vm700_vm9, %v3009_v63, %v2025_v61 }
 0x321   :  { %v2686_v2 = vpop.eup %2685  ;;  %v3040_v5 = vpack.c.bf16 %v780_v4, %v779_v3  ;;  %vm705_vm14 = vcmp.gt.f32.partialorder %v685_v21, 0.0  ;;  %v3062_v3 = vld [vmem:[%s3208_s4 + $0x2] sm:$0x3] }
 0x322   :  { %v751_v59 = vmul.f32 1.442695, %v721_v62  ;;  %v688_v1 = vadd.f32 %v2191_v0, %v2980_v35  ;;  %v2026_v9 = vadd.f32 -1.0, %v2686_v2 }
 0x323   :  { %2472 = vmatprep.mubr.bf16.mxu1 %v3040_v5 }
 0x324   :  { %2693 = vpow2.f32 %v751_v59  ;;  %v722_v6 = vmin.f32 %v688_v1, 0.0  ;;  %v781_v39 = vsel %vm701_vm10, %v3014_v8, %v2026_v9  ;;  %vm706_vm15 = vcmp.gt.f32.partialorder %v688_v1, 0.0 }
 0x325   :  { %v2688_v10 = vpop.eup %2687 }
 0x326   :  { %v753_v11 = vmul.f32 1.442695, %v722_v6  ;;  %v2027_v12 = vadd.f32 -1.0, %v2688_v10 }
 0x328   :  { %2695 = vpow2.f32 %v753_v11  ;;  %v782_v63 = vsel %vm702_vm11, %v672_v16, %v2027_v12 }
 0x329   :  { %v2690_v13 = vpop.eup %2689  ;;  %v3045_v17 = vpack.c.bf16 %v782_v63, %v781_v39 }
 0x32a   :  { %v2028_v35 = vadd.f32 -1.0, %v2690_v13 }
 0x32b   :  { %2473 = vmatmul.mubr.bf16.gmra.mxu1 %v3045_v17 }
 0x32c   :  { %v783_v19 = vsel %vm703_vm12, %v677_v7, %v2028_v35  ;;  %v2625_v7 = vld [vmem:[#allocation8 + $0xf8] sm:$0xff]  }
 0x32d   :  { %v2692_v15 = vpop.eup %2691  ;;  %2224 = vmatprep.subr.bf16.mxu0 %v2625_v7 }
 0x32e   :  { %v2029_v18 = vadd.f32 -1.0, %v2692_v15  ;;  %2225 = vmatpush3.bf16.msra.mxu0 %v2626_v29 }
 0x32f   :  { %2226 = vmatprep.subr.bf16.mxu0 %v2627_v14 }
 0x330   :  { %v784_v23 = vsel %vm704_vm13, %v680_v42, %v2029_v18 }
 0x331   :  { %v2694_v24 = vpop.eup %2693  ;;  %v3048_v22 = vpack.c.bf16 %v784_v23, %v783_v19 }
 0x332   :  { %v2030_v25 = vadd.f32 -1.0, %v2694_v24  ;;  %2227 = vmatpush3.bf16.msra.mxu0 %v2628_v31 }
 0x333   :  { %2476 = vmatprep.mubr.bf16.mxu1 %v3048_v22  ;;  %2228 = vmatprep.subr.bf16.mxu0 %v2629_v30 }
 0x334   :  { %v785_v27 = vsel %vm705_vm14, %v685_v21, %v2030_v25 }
 0x335   :  { %v2696_v8 = vpop.eup %2695 }
 0x336   :  { %v2031_v16 = vadd.f32 -1.0, %v2696_v8  ;;  %2229 = vmatpush3.bf16.msra.mxu0 %v2630_v36 }
 0x337   :  { %2230 = vmatprep.subr.bf16.mxu0 %v2631_v37 }
 0x338   :  { %v786_v26 = vsel %vm706_vm15, %v688_v1, %v2031_v16  ;;  %v815_v1 = vrot.slane %v3062_v3, %v2937_v58 }
 0x339   :  { %v3051_v28 = vpack.c.bf16 %v786_v26, %v785_v27 }
 0x33a   :  { %2231 = vmatpush3.bf16.msra.mxu0 %v2632_v38 }
 0x33b   :  { %2477 = vmatmul.mubr.bf16.gmra.mxu1 %v3051_v28  ;;  %2232 = vmatprep.subr.bf16.mxu0 %v2633_v40 }
 0x33c   :  { %2496 = vmatprep.mubr.bf16.mxu1 %v2929_v32  ;;  %v2635_v32 = vld [vmem:[#allocation8 + $0xd0] sm:$0xff]  }
 0x33e   :  { %2233 = vmatpush3.bf16.msra.mxu0 %v2634_v41 }
 0x33f   :  { %2234 = vmatprep.subr.bf16.mxu0 %v2635_v32 }
 0x342   :  { %2235 = vmatpush3.bf16.msra.mxu0 %v2636_v44 }
 0x343   :  { %2236 = vmatprep.subr.bf16.mxu0 %v2637_v51 }
 0x346   :  { %2237 = vmatpush3.bf16.msra.mxu0 %v2638_v55 }
 0x3cb   :  { %v3055_v42 = vpop.f32.mrf.mxu1 }
 0x3cc   :  { %v907_v55 = vadd.f32 %v3055_v42, %v815_v1  ;;  %v2639_v42 = vld [vmem:[#allocation8 + $0xc0] sm:$0xff]  }
 0x3cd   :  { %v3057_v49 = vpop.f32.mrf.mxu1  ;;  %2238 = vmatprep.subr.bf16.mxu0 %v2639_v42 }
 0x3cf   :  { %v2467_v52 = vpop.f32.mrf.mxu1 }
 0x3d0   :  { %v910_v32 = vadd.f32 %v2467_v52, %v815_v1 }
 0x3d1   :  { %v901_v50 = vpop.f32.mrf.mxu1 }
 0x3db   :  { %v2470_v60 = vpop.f32.mrf.mxu1 }
 0x3dc   :  { %v923_v31 = vadd.f32 %v2470_v60, %v815_v1 }
 0x3dd   :  { %v914_v21 = vpop.f32.mrf.mxu1 }
 0x3de   :  { %v967_v40 = vmax.f32 %v923_v31, 0.0  ;;  %v915_v41 = vadd.f32 %v914_v21, %v815_v1 }
 0x3df   :  { %v2471_v61 = vpop.f32.mrf.mxu1 }
 0x3e0   :  { %v926_v7 = vadd.f32 %v2471_v61, %v815_v1  ;;  %v965_v61 = vmax.f32 %v915_v41, 0.0 }
 0x3e1   :  { %v917_v34 = vpop.f32.mrf.mxu1 }
 0x3e2   :  { %v968_v36 = vmax.f32 %v926_v7, 0.0  ;;  %v918_v37 = vadd.f32 %v917_v34, %v815_v1  ;;  %v899_v34 = vadd.f32 %v3057_v49, %v815_v1  ;;  %v2640_v49 = vld [vmem:[#allocation8 + $0x80] sm:$0xff]  }
 0x3e3   :  { %2239 = vmatpush3.bf16.msra.mxu0 %v2640_v49 }
 0x3e4   :  { %v980_v44 = vpack.c.bf16 %v968_v36, %v967_v40  ;;  %v966_v51 = vmax.f32 %v918_v37, 0.0  ;;  %v961_v21 = vmax.f32 %v899_v34, 0.0 }
 0x3e6   :  { %v979_v60 = vpack.c.bf16 %v966_v51, %v965_v61 }
 0x3eb   :  { %v2474_v62 = vpop.f32.mrf.mxu1 }
 0x3ec   :  { %v939_v18 = vadd.f32 %v2474_v62, %v815_v1  ;;  %v964_v62 = vmax.f32 %v910_v32, 0.0 }
 0x3ed   :  { %v930_v0 = vpop.f32.mrf.mxu1 }
 0x3ee   :  { %v971_v27 = vmax.f32 %v939_v18, 0.0  ;;  %v931_v26 = vadd.f32 %v930_v0, %v815_v1  ;;  %v902_v0 = vadd.f32 %v901_v50, %v815_v1 }
 0x3ef   :  { %v2475_v2 = vpop.f32.mrf.mxu1 }
 0x3f0   :  { %v942_v63 = vadd.f32 %v2475_v2, %v815_v1  ;;  %v969_v30 = vmax.f32 %v931_v26, 0.0  ;;  %v963_v2 = vmax.f32 %v907_v55, 0.0 }
 0x3f1   :  { %v933_v4 = vpop.f32.mrf.mxu1 }
 0x3f2   :  { %v972_v25 = vmax.f32 %v942_v63, 0.0  ;;  %v934_v8 = vadd.f32 %v933_v4, %v815_v1  ;;  %v978_v4 = vpack.c.bf16 %v964_v62, %v963_v2 }
 0x3f4   :  { %v982_v29 = vpack.c.bf16 %v972_v25, %v971_v27  ;;  %v970_v14 = vmax.f32 %v934_v8, 0.0  ;;  %v2646_v25 = vld [vmem:[#allocation7 + $0x90] sm:$0xff]   ;;  %v2648_v8 = vld [vmem:[#allocation7 + $0x80] sm:$0xff]   ;;  %v3084_v27 = vrot.slane %v3062_v3, %v2976_v33 }
 0x3f6   :  { %v981_v38 = vpack.c.bf16 %v970_v14, %v969_v30 }
 0x3fb   :  { %v2478_v59 = vpop.f32.mrf.mxu1 }
 0x3fc   :  { %v955_v9 = vadd.f32 %v2478_v59, %v815_v1  ;;  %v962_v59 = vmax.f32 %v902_v0, 0.0 }
 0x3fd   :  { %v946_v6 = vpop.f32.mrf.mxu1 }
 0x3fe   :  { %v947_v11 = vadd.f32 %v946_v6, %v815_v1  ;;  %v975_v13 = vmax.f32 %v955_v9, 0.0  ;;  %v977_v52 = vpack.c.bf16 %v962_v59, %v961_v21 }
 0x3ff   :  { %v2479_v10 = vpop.f32.mrf.mxu1 }
 0x400   :  { %v958_v12 = vadd.f32 %v2479_v10, %v815_v1  ;;  %v973_v19 = vmax.f32 %v947_v11, 0.0 }
 0x401   :  { %v949_v39 = vpop.f32.mrf.mxu1 }
 0x402   :  { %v976_v35 = vmax.f32 %v958_v12, 0.0  ;;  %v950_v15 = vadd.f32 %v949_v39, %v815_v1 }
 0x404   :  { %v984_v23 = vpack.c.bf16 %v976_v35, %v975_v13  ;;  %v974_v24 = vmax.f32 %v950_v15, 0.0 }
 0x406   :  { %v983_v16 = vpack.c.bf16 %v974_v24, %v973_v19  ;;  %2480 = vmatprep.subr.bf16.mxu1 %v984_v23  ;;  %v2644_v24 = vld [vmem:[#allocation7 + $0xa0] sm:$0xff]  }
 0x407   :  { %2481 = vmatpush3.bf16.msra.mxu1 %v984_v23  ;;  %v2642_v23 = vld [vmem:[#allocation7 + $0xb0] sm:$0xff]  }
 0x408   :  { %2482 = vmatprep.subr.bf16.mxu1 %v983_v16 }
 0x40b   :  { %2483 = vmatpush3.bf16.msra.mxu1 %v983_v16 }
 0x40c   :  { %2484 = vmatprep.subr.bf16.mxu1 %v982_v29 }
 0x40f   :  { %2485 = vmatpush3.bf16.msra.mxu1 %v982_v29 }
 0x410   :  { %2486 = vmatprep.subr.bf16.mxu1 %v981_v38 }
 0x413   :  { %2487 = vmatpush3.bf16.msra.mxu1 %v981_v38 }
 0x414   :  { %2488 = vmatprep.subr.bf16.mxu1 %v980_v44 }
 0x417   :  { %2489 = vmatpush3.bf16.msra.mxu1 %v980_v44 }
 0x418   :  { %2490 = vmatprep.subr.bf16.mxu1 %v979_v60 }
 0x41b   :  { %2491 = vmatpush3.bf16.msra.mxu1 %v979_v60 }
 0x41c   :  { %2492 = vmatprep.subr.bf16.mxu1 %v978_v4 }
 0x41f   :  { %2493 = vmatpush3.bf16.msra.mxu1 %v978_v4 }
 0x420   :  { %2494 = vmatprep.subr.bf16.mxu1 %v977_v52 }
 0x423   :  { %2495 = vmatpush3.bf16.msra.mxu1 %v977_v52 }
 0x426   :  { %2497 = vmatmul.mubr.bf16.vlgmr.msra.gmra.mxu1 %v2947_v53 }
 0x427   :  { %2500 = vmatprep.mubr.bf16.mxu1 %v2949_v45 }
 0x42e   :  { %2501 = vmatmul.mubr.bf16.gmra.mxu1 %v2953_v48 }
 0x42f   :  { %2504 = vmatprep.mubr.bf16.mxu1 %v2955_v46 }
 0x436   :  { %2505 = vmatmul.mubr.bf16.gmra.mxu1 %v2959_v54 }
 0x437   :  { %2508 = vmatprep.mubr.bf16.mxu1 %v2961_v56 }
 0x43e   :  { %2509 = vmatmul.mubr.bf16.gmra.mxu1 %v2965_v57 }
 0x4e6   :  { %v2498_v50 = vpop.f32.mrf.mxu1 }
 0x4e8   :  { %v1019_v1 = vpop.f32.mrf.mxu1 }
 0x4ea   :  { %v2499_v6 = vpop.f32.mrf.mxu1 }
 0x4eb   :  { %v1083_v46 = vpack.c.bf16 %v2499_v6, %v2498_v50 }
 0x4ec   :  { %v1022_v53 = vpop.f32.mrf.mxu1 }
 0x4ed   :  { %v1082_v9 = vpack.c.bf16 %v1022_v53, %v1019_v1 }
 0x4ee   :  { %v2502_v45 = vpop.f32.mrf.mxu1 }
 0x4ef   :  { %1256 = vmatmul.mubr.bf16.vlgmr.msra.gmra.mxu0 %v1082_v9 }
 0x4f0   :  { %1263 = vmatprep.mubr.bf16.mxu0 %v3005_v47  ;;  %v1035_v48 = vpop.f32.mrf.mxu1 }
 0x4f2   :  { %v2503_v54 = vpop.f32.mrf.mxu1 }
 0x4f3   :  { %v1085_v12 = vpack.c.bf16 %v2503_v54, %v2502_v45 }
 0x4f4   :  { %v1038_v56 = vpop.f32.mrf.mxu1 }
 0x4f5   :  { %v1084_v57 = vpack.c.bf16 %v1038_v56, %v1035_v48 }
 0x4f6   :  { %v2506_v10 = vpop.f32.mrf.mxu1 }
 0x4f7   :  { %1264 = vmatmul.mubr.bf16.gmra.mxu0 %v1083_v46 }
 0x4f8   :  { %1271 = vmatprep.mubr.bf16.mxu0 %v3022_v20  ;;  %v1051_v11 = vpop.f32.mrf.mxu1 }
 0x4fa   :  { %v2507_v39 = vpop.f32.mrf.mxu1 }
 0x4fb   :  { %v1087_v20 = vpack.c.bf16 %v2507_v39, %v2506_v10 }
 0x4fc   :  { %v1054_v63 = vpop.f32.mrf.mxu1 }
 0x4fd   :  { %v1086_v47 = vpack.c.bf16 %v1054_v63, %v1051_v11 }
 0x4fe   :  { %v2510_v13 = vpop.f32.mrf.mxu1 }
 0x4ff   :  { %1272 = vmatmul.mubr.bf16.gmra.mxu0 %v1084_v57 }
 0x500   :  { %1279 = vmatprep.mubr.bf16.mxu0 %v3031_v43  ;;  %v1067_v35 = vpop.f32.mrf.mxu1 }
 0x502   :  { %v2511_v15 = vpop.f32.mrf.mxu1 }
 0x503   :  { %v1089_v19 = vpack.c.bf16 %v2511_v15, %v2510_v13 }
 0x504   :  { %v1070_v18 = vpop.f32.mrf.mxu1 }
 0x505   :  { %v1088_v43 = vpack.c.bf16 %v1070_v18, %v1067_v35 }
 0x507   :  { %1280 = vmatmul.mubr.bf16.gmra.mxu0 %v1085_v12 }
 0x508   :  { %1287 = vmatprep.mubr.bf16.mxu0 %v3040_v5  ;;  %v2641_v5 = vld [vmem:[#allocation7 + $0xb8] sm:$0xff]  }
 0x509   :  { %2512 = vmatprep.subr.bf16.mxu1 %v2641_v5 }
 0x50a   :  { %2513 = vmatpush3.bf16.msra.mxu1 %v2641_v5 }
 0x50b   :  { %2514 = vmatprep.subr.bf16.mxu1 %v2642_v23 }
 0x50e   :  { %2515 = vmatpush3.bf16.msra.mxu1 %v2642_v23 }
 0x50f   :  { %1288 = vmatmul.mubr.bf16.gmra.mxu0 %v1086_v47 }
 0x510   :  { %1295 = vmatprep.mubr.bf16.mxu0 %v3045_v17  ;;  %v2643_v17 = vld [vmem:[#allocation7 + $0xa8] sm:$0xff]  }
 0x511   :  { %2516 = vmatprep.subr.bf16.mxu1 %v2643_v17 }
 0x512   :  { %2517 = vmatpush3.bf16.msra.mxu1 %v2643_v17 }
 0x513   :  { %2518 = vmatprep.subr.bf16.mxu1 %v2644_v24 }
 0x516   :  { %2519 = vmatpush3.bf16.msra.mxu1 %v2644_v24 }
 0x517   :  { %1296 = vmatmul.mubr.bf16.gmra.mxu0 %v1087_v20 }
 0x518   :  { %1303 = vmatprep.mubr.bf16.mxu0 %v3048_v22  ;;  %v2645_v22 = vld [vmem:[#allocation7 + $0x98] sm:$0xff]  }
 0x519   :  { %2520 = vmatprep.subr.bf16.mxu1 %v2645_v22 }
 0x51a   :  { %2521 = vmatpush3.bf16.msra.mxu1 %v2645_v22 }
 0x51b   :  { %2522 = vmatprep.subr.bf16.mxu1 %v2646_v25 }
 0x51e   :  { %2523 = vmatpush3.bf16.msra.mxu1 %v2646_v25 }
 0x51f   :  { %1304 = vmatmul.mubr.bf16.gmra.mxu0 %v1088_v43 }
 0x520   :  { %1311 = vmatprep.mubr.bf16.mxu0 %v3051_v28  ;;  %v2647_v28 = vld [vmem:[#allocation7 + $0x88] sm:$0xff]  }
 0x521   :  { %2524 = vmatprep.subr.bf16.mxu1 %v2647_v28 }
 0x522   :  { %2525 = vmatpush3.bf16.msra.mxu1 %v2647_v28 }
 0x523   :  { %2526 = vmatprep.subr.bf16.mxu1 %v2648_v8 }
 0x526   :  { %2527 = vmatpush3.bf16.msra.mxu1 %v2648_v8 }
 0x527   :  { %1312 = vmatmul.mubr.bf16.gmra.mxu0 %v1089_v19 }
 0x5af   :  { %v2240_v16 = vpop.f32.mrf.mxu0 }
 0x5b1   :  { %v2241_v26 = vpop.f32.mrf.mxu0 }
 0x5b2   :  { %v2242_v7 = vadd.f32 %v2241_v26, %v2240_v16 }
 0x5b3   :  { %v2243_v29 = vpop.f32.mrf.mxu0 }
 0x5b4   :  { %v1258_v14 = vadd.f32 %v2242_v7, %v3084_v27 }
 0x5b5   :  { %v2244_v31 = vpop.f32.mrf.mxu0 }
 0x5b6   :  { %v1336_v30 = vmin.f32 %v1258_v14, 0.0  ;;  %v2245_v36 = vadd.f32 %v2244_v31, %v2243_v29  ;;  %vm1320_vm0 = vcmp.gt.f32.partialorder %v1258_v14, 0.0 }
 0x5b7   :  { %v2246_v37 = vpop.f32.mrf.mxu0 }
 0x5b8   :  { %v1352_v38 = vmul.f32 1.442695, %v1336_v30  ;;  %v1261_v40 = vadd.f32 %v2245_v36, %v3084_v27 }
 0x5b9   :  { %v2247_v41 = vpop.f32.mrf.mxu0 }
 0x5ba   :  { %v1337_v32 = vmin.f32 %v1261_v40, 0.0  ;;  %v2248_v44 = vadd.f32 %v2247_v41, %v2246_v37  ;;  %2697 = vpow2.f32 %v1352_v38  ;;  %vm1321_vm1 = vcmp.gt.f32.partialorder %v1261_v40, 0.0 }
 0x5bb   :  { %v2249_v51 = vpop.f32.mrf.mxu0 }
 0x5bc   :  { %v1354_v55 = vmul.f32 1.442695, %v1337_v32  ;;  %v1266_v3 = vadd.f32 %v2248_v44, %v3084_v27 }
 0x5bd   :  { %v2250_v61 = vpop.f32.mrf.mxu0 }
 0x5be   :  { %2699 = vpow2.f32 %v1354_v55  ;;  %v1338_v62 = vmin.f32 %v1266_v3, 0.0  ;;  %v2251_v0 = vadd.f32 %v2250_v61, %v2249_v51  ;;  %vm1322_vm2 = vcmp.gt.f32.partialorder %v1266_v3, 0.0 }
 0x5bf   :  { %v2252_v60 = vpop.f32.mrf.mxu0 }
 0x5c0   :  { %v1356_v2 = vmul.f32 1.442695, %v1338_v62  ;;  %v1269_v34 = vadd.f32 %v2251_v0, %v3084_v27 }
 0x5c1   :  { %v2253_v4 = vpop.f32.mrf.mxu0 }
 0x5c2   :  { %2701 = vpow2.f32 %v1356_v2  ;;  %v1339_v59 = vmin.f32 %v1269_v34, 0.0  ;;  %v2254_v21 = vadd.f32 %v2253_v4, %v2252_v60  ;;  %vm1323_vm3 = vcmp.gt.f32.partialorder %v1269_v34, 0.0 }
 0x5c3   :  { %v2255_v52 = vpop.f32.mrf.mxu0 }
 0x5c4   :  { %v1358_v42 = vmul.f32 1.442695, %v1339_v59  ;;  %v3091_v49 = vadd.f32 %v2254_v21, %v3084_v27 }
 0x5c5   :  { %v2256_v50 = vpop.f32.mrf.mxu0 }
 0x5c6   :  { %2703 = vpow2.f32 %v1358_v42  ;;  %v1340_v1 = vmin.f32 %v3091_v49, 0.0  ;;  %v2257_v6 = vadd.f32 %v2256_v50, %v2255_v52  ;;  %vm1324_vm4 = vcmp.gt.f32.partialorder %v3091_v49, 0.0 }
 0x5c7   :  { %v2258_v53 = vpop.f32.mrf.mxu0  ;;  %v2698_v9 = vpop.eup %2697 }
 0x5c8   :  { %v1360_v45 = vmul.f32 1.442695, %v1340_v1  ;;  %v3095_v48 = vadd.f32 %v2257_v6, %v3084_v27  ;;  %v2056_v11 = vadd.f32 -1.0, %v2698_v9 }
 0x5c9   :  { %v2259_v46 = vpop.f32.mrf.mxu0 }
 0x5ca   :  { %v1341_v54 = vmin.f32 %v3095_v48, 0.0  ;;  %v2260_v56 = vadd.f32 %v2259_v46, %v2258_v53  ;;  %2705 = vpow2.f32 %v1360_v45  ;;  %v1400_v18 = vsel %vm1320_vm0, %v1258_v14, %v2056_v11 }
 0x5cb   :  { %v2700_v57 = vpop.eup %2699  ;;  %v2261_v10 = vpop.f32.mrf.mxu0  ;;  %vm1325_vm5 = vcmp.gt.f32.partialorder %v3095_v48, 0.0 }
 0x5cc   :  { %v1362_v12 = vmul.f32 1.442695, %v1341_v54  ;;  %v3099_v39 = vadd.f32 %v2260_v56, %v3084_v27  ;;  %v2057_v63 = vadd.f32 -1.0, %v2700_v57 }
 0x5cd   :  { %v2262_v47 = vpop.f32.mrf.mxu0 }
 0x5ce   :  { %2707 = vpow2.f32 %v1362_v12  ;;  %v1342_v13 = vmin.f32 %v3099_v39, 0.0  ;;  %v2263_v35 = vadd.f32 %v2262_v47, %v2261_v10  ;;  %v1401_v43 = vsel %vm1321_vm1, %v1261_v40, %v2057_v63 }
 0x5cf   :  { %v2702_v20 = vpop.eup %2701  ;;  %v2264_v15 = vpop.f32.mrf.mxu0  ;;  %v1416_v23 = vpack.c.bf16 %v1401_v43, %v1400_v18  ;;  %vm1326_vm6 = vcmp.gt.f32.partialorder %v3099_v39, 0.0 }
 0x5d0   :  { %v1364_v19 = vmul.f32 1.442695, %v1342_v13  ;;  %v3103_v5 = vadd.f32 %v2263_v35, %v3084_v27  ;;  %v2058_v24 = vadd.f32 -1.0, %v2702_v20 }
 0x5d1   :  { %v2265_v17 = vpop.f32.mrf.mxu0  ;;  %2528 = vmatprep.mubr.bf16.mxu1 %v1416_v23  ;;  %1884 = vmatprep.mubr.bf16.mxu0 %v1416_v23 }
 0x5d2   :  { %v1343_v22 = vmin.f32 %v3103_v5, 0.0  ;;  %2709 = vpow2.f32 %v1364_v19  ;;  %v2266_v28 = vadd.f32 %v2265_v17, %v2264_v15  ;;  %v1402_v14 = vsel %vm1322_vm2, %v1266_v3, %v2058_v24 }
 0x5d3   :  { %v2704_v25 = vpop.eup %2703  ;;  %v2267_v8 = vpop.f32.mrf.mxu0  ;;  %vm1327_vm7 = vcmp.gt.f32.partialorder %v3103_v5, 0.0 }
 0x5d4   :  { %v2059_v16 = vadd.f32 -1.0, %v2704_v25  ;;  %v1366_v26 = vmul.f32 1.442695, %v1343_v22  ;;  %v3107_v7 = vadd.f32 %v2266_v28, %v3084_v27 }
 0x5d5   :  { %v2268_v29 = vpop.f32.mrf.mxu0 }
 0x5d6   :  { %v1403_v31 = vsel %vm1323_vm3, %v1269_v34, %v2059_v16  ;;  %2711 = vpow2.f32 %v1366_v26  ;;  %v2269_v30 = vadd.f32 %v2268_v29, %v2267_v8  ;;  %v1344_v37 = vmin.f32 %v3107_v7, 0.0 }
 0x5d7   :  { %v3109_v36 = vpack.c.bf16 %v1403_v31, %v1402_v14  ;;  %v2270_v38 = vpop.f32.mrf.mxu0  ;;  %v2706_v40 = vpop.eup %2705  ;;  %vm1328_vm8 = vcmp.gt.f32.partialorder %v3107_v7, 0.0 }
 0x5d8   :  { %v3113_v41 = vadd.f32 %v2269_v30, %v3084_v27  ;;  %v1368_v32 = vmul.f32 1.442695, %v1344_v37  ;;  %v2060_v62 = vadd.f32 -1.0, %v2706_v40 }
 0x5d9   :  { %v2271_v44 = vpop.f32.mrf.mxu0  ;;  %2529 = vmatmul.mubr.bf16.vlgmr.msra.gmra.mxu1 %v3109_v36 }
 0x5da   :  { %v1345_v51 = vmin.f32 %v3113_v41, 0.0  ;;  %v2272_v55 = vadd.f32 %v2271_v44, %v2270_v38  ;;  %2713 = vpow2.f32 %v1368_v32  ;;  %v1404_v52 = vsel %vm1324_vm4, %v3091_v49, %v2060_v62 }
 0x5db   :  { %v2708_v3 = vpop.eup %2707  ;;  %v2273_v61 = vpop.f32.mrf.mxu0  ;;  %vm1329_vm9 = vcmp.gt.f32.partialorder %v3113_v41, 0.0 }
 0x5dc   :  { %v1370_v0 = vmul.f32 1.442695, %v1345_v51  ;;  %v3118_v60 = vadd.f32 %v2272_v55, %v3084_v27  ;;  %v2061_v2 = vadd.f32 -1.0, %v2708_v3 }
 0x5dd   :  { %v2274_v34 = vpop.f32.mrf.mxu0 }
 0x5de   :  { %2715 = vpow2.f32 %v1370_v0  ;;  %v1346_v4 = vmin.f32 %v3118_v60, 0.0  ;;  %v2275_v59 = vadd.f32 %v2274_v34, %v2273_v61  ;;  %v1405_v42 = vsel %vm1325_vm5, %v3095_v48, %v2061_v2 }
 0x5df   :  { %v2276_v21 = vpop.f32.mrf.mxu0  ;;  %v2710_v50 = vpop.eup %2709  ;;  %v3126_v53 = vpack.c.bf16 %v1405_v42, %v1404_v52  ;;  %vm1330_vm10 = vcmp.gt.f32.partialorder %v3118_v60, 0.0 }
 0x5e0   :  { %v1372_v1 = vmul.f32 1.442695, %v1346_v4  ;;  %v1301_v6 = vadd.f32 %v2275_v59, %v3084_v27  ;;  %v2062_v57 = vadd.f32 -1.0, %v2710_v50 }
 0x5e1   :  { %v2277_v9 = vpop.f32.mrf.mxu0  ;;  %2532 = vmatprep.mubr.bf16.mxu1 %v3126_v53 }
 0x5e2   :  { %2717 = vpow2.f32 %v1372_v1  ;;  %v1347_v45 = vmin.f32 %v1301_v6, 0.0  ;;  %v2278_v46 = vadd.f32 %v2277_v9, %v2276_v21  ;;  %v1406_v13 = vsel %vm1326_vm6, %v3099_v39, %v2062_v57  ;;  %v2649_v9 = vld [vmem:[#allocation8 + $0x178] sm:$0xff]   ;;  %v2654_v57 = vld [vmem:[#allocation8 + $0x128] sm:$0xff]  }
 0x5e3   :  { %v2712_v54 = vpop.eup %2711  ;;  %v2279_v56 = vpop.f32.mrf.mxu0  ;;  %vm1331_vm11 = vcmp.gt.f32.partialorder %v1301_v6, 0.0  ;;  %2320 = vmatprep.subr.bf16.mxu0 %v2649_v9 }
 0x5e4   :  { %v1374_v10 = vmul.f32 1.442695, %v1347_v45  ;;  %v1306_v49 = vadd.f32 %v2278_v46, %v3084_v27  ;;  %v2063_v11 = vadd.f32 -1.0, %v2712_v54  ;;  %v2650_v45 = vld [vmem:[#allocation8 + $0x138] sm:$0xff]   ;;  %v2651_v46 = vld [vmem:[#allocation8 + $0x170] sm:$0xff]  }
 0x5e5   :  { %v2280_v48 = vpop.f32.mrf.mxu0  ;;  %2321 = vmatpush3.bf16.msra.mxu0 %v2650_v45  ;;  %v2652_v54 = vld [vmem:[#allocation8 + $0x130] sm:$0xff]  }
 0x5e6   :  { %2719 = vpow2.f32 %v1374_v10  ;;  %v1348_v12 = vmin.f32 %v1306_v49, 0.0  ;;  %v2281_v63 = vadd.f32 %v2280_v48, %v2279_v56  ;;  %v1407_v35 = vsel %vm1327_vm7, %v3103_v5, %v2063_v11  ;;  %2322 = vmatprep.subr.bf16.mxu0 %v2651_v46  ;;  %v2653_v56 = vld [vmem:[#allocation8 + $0x168] sm:$0xff]   ;;  %v2655_v10 = vld [vmem:[#allocation8 + $0x160] sm:$0xff]   ;;  %v2657_v11 = vld [vmem:[#allocation8 + $0x158] sm:$0xff]  }
 0x5e7   :  { %v2282_v47 = vpop.f32.mrf.mxu0  ;;  %v2714_v20 = vpop.eup %2713  ;;  %v3135_v43 = vpack.c.bf16 %v1407_v35, %v1406_v13  ;;  %vm1332_vm12 = vcmp.gt.f32.partialorder %v1306_v49, 0.0  ;;  %v2658_v48 = vld [vmem:[#allocation8 + $0x118] sm:$0xff]   ;;  %v2661_v13 = vld [vmem:[#allocation8 + $0x148] sm:$0xff]  }
 0x5e8   :  { %v1376_v15 = vmul.f32 1.442695, %v1348_v12  ;;  %v1309_v18 = vadd.f32 %v2281_v63, %v3084_v27  ;;  %v2064_v25 = vadd.f32 -1.0, %v2714_v20  ;;  %v2659_v12 = vld [vmem:[#allocation8 + $0x150] sm:$0xff]   ;;  %v2662_v20 = vld [vmem:[#allocation8 + $0x108] sm:$0xff]  }
 0x5e9   :  { %v2283_v19 = vpop.f32.mrf.mxu0  ;;  %2533 = vmatmul.mubr.bf16.gmra.mxu1 %v3135_v43  ;;  %2323 = vmatpush3.bf16.msra.mxu0 %v2652_v54 }
 0x5ea   :  { %2721 = vpow2.f32 %v1376_v15  ;;  %v1349_v23 = vmin.f32 %v1309_v18, 0.0  ;;  %v2284_v17 = vadd.f32 %v2283_v19, %v2282_v47  ;;  %v1408_v14 = vsel %vm1328_vm8, %v3107_v7, %v2064_v25  ;;  %2324 = vmatprep.subr.bf16.mxu0 %v2653_v56  ;;  %v2660_v47 = vld [vmem:[#allocation8 + $0x110] sm:$0xff]  }
 0x5eb   :  { %v2716_v24 = vpop.eup %2715  ;;  %v2285_v22 = vpop.f32.mrf.mxu0  ;;  %vm1333_vm13 = vcmp.gt.f32.partialorder %v1309_v18, 0.0 }
 0x5ec   :  { %v1378_v28 = vmul.f32 1.442695, %v1349_v23  ;;  %v1314_v39 = vadd.f32 %v2284_v17, %v3084_v27  ;;  %v2065_v8 = vadd.f32 -1.0, %v2716_v24 }
 0x5ed   :  { %v2286_v5 = vpop.f32.mrf.mxu0  ;;  %2325 = vmatpush3.bf16.msra.mxu0 %v2654_v57 }
 0x5ee   :  { %2723 = vpow2.f32 %v1378_v28  ;;  %v1350_v16 = vmin.f32 %v1314_v39, 0.0  ;;  %v2287_v26 = vadd.f32 %v2286_v5, %v2285_v22  ;;  %v1409_v31 = vsel %vm1329_vm9, %v3113_v41, %v2065_v8  ;;  %2326 = vmatprep.subr.bf16.mxu0 %v2655_v10 }
 0x5ef   :  { %v2718_v29 = vpop.eup %2717  ;;  %v3144_v38 = vpack.c.bf16 %v1409_v31, %v1408_v14  ;;  %vm1334_vm14 = vcmp.gt.f32.partialorder %v1314_v39, 0.0 }
 0x5f0   :  { %v1380_v30 = vmul.f32 1.442695, %v1350_v16  ;;  %v1317_v37 = vadd.f32 %v2287_v26, %v3084_v27  ;;  %v2066_v32 = vadd.f32 -1.0, %v2718_v29 }
 0x5f1   :  { %2536 = vmatprep.mubr.bf16.mxu1 %v3144_v38 }
 0x5f2   :  { %2725 = vpow2.f32 %v1380_v30  ;;  %v1351_v40 = vmin.f32 %v1317_v37, 0.0  ;;  %v1410_v7 = vsel %vm1330_vm10, %v3118_v60, %v2066_v32  ;;  %vm1335_vm15 = vcmp.gt.f32.partialorder %v1317_v37, 0.0 }
 0x5f3   :  { %v2720_v44 = vpop.eup %2719 }
 0x5f4   :  { %v1382_v51 = vmul.f32 1.442695, %v1351_v40  ;;  %v2067_v55 = vadd.f32 -1.0, %v2720_v44 }
 0x5f6   :  { %2727 = vpow2.f32 %v1382_v51  ;;  %v1411_v41 = vsel %vm1331_vm11, %v1301_v6, %v2067_v55  ;;  %v2729_v6 = vld [vmem:[#allocation5] sm:$0xff]  }
 0x5f7   :  { %v2722_v3 = vpop.eup %2721  ;;  %v3149_v61 = vpack.c.bf16 %v1411_v41, %v1410_v7 }
 0x5f8   :  { %v2068_v27 = vadd.f32 -1.0, %v2722_v3 }
 0x5f9   :  { %2537 = vmatmul.mubr.bf16.gmra.mxu1 %v3149_v61 }
 0x5fa   :  { %v1412_v2 = vsel %vm1332_vm12, %v1306_v49, %v2068_v27  ;;  %v2656_v49 = vld [vmem:[#allocation8 + $0x120] sm:$0xff]  }
 0x5fb   :  { %v2724_v62 = vpop.eup %2723  ;;  %2327 = vmatpush3.bf16.msra.mxu0 %v2656_v49 }
 0x5fc   :  { %v2069_v0 = vadd.f32 -1.0, %v2724_v62  ;;  %2328 = vmatprep.subr.bf16.mxu0 %v2657_v11 }
 0x5fe   :  { %v1413_v34 = vsel %vm1333_vm13, %v1309_v18, %v2069_v0 }
 0x5ff   :  { %v2726_v4 = vpop.eup %2725  ;;  %v3152_v59 = vpack.c.bf16 %v1413_v34, %v1412_v2  ;;  %2329 = vmatpush3.bf16.msra.mxu0 %v2658_v48 }
 0x600   :  { %v2070_v21 = vadd.f32 -1.0, %v2726_v4  ;;  %2330 = vmatprep.subr.bf16.mxu0 %v2659_v12 }
 0x601   :  { %2540 = vmatprep.mubr.bf16.mxu1 %v3152_v59 }
 0x602   :  { %v1414_v42 = vsel %vm1334_vm14, %v1314_v39, %v2070_v21  ;;  %v3165_v39 = vld [vmem:[%s3208_s4 + $0x4] sm:$0x3]  ;;  %s2853_s4 = smov [#allocation10]  }
 0x603   :  { %v2728_v60 = vpop.eup %2727  ;;  %2331 = vmatpush3.bf16.msra.mxu0 %v2660_v47  ;;  %v1444_v16 = vrot.slane %v3165_v39, %v2937_v58  ;;  %s1970_s19 = sshll.u32 %s2853_s4, 4  ;;  %s1971_s19 = int_to_ptr.vmem [resolvable:$true] %s1970_s19 }
 0x604   :  { %v2071_v52 = vadd.f32 -1.0, %v2728_v60  ;;  %2332 = vmatprep.subr.bf16.mxu0 %v2661_v13  ;;  %s2817_s20 = scalar_lea.vmem %s1971_s19, 2048  ;;  %p2822_p7 = scmp.lt.s32.totalorder %s1971_s19, %s1971_s19 }
 0x605   :  { %p2818_p6 = scmp.ne.s32.totalorder %s1971_s19, %s2817_s20  ;;  %p2823_p8 = scmp.lt.s32.totalorder %s2817_s20, %s2817_s20 }
 0x606   :  { %v1415_v50 = vsel %vm1335_vm15, %v1317_v37, %v2071_v52 }
 0x607   :  { %v3155_v1 = vpack.c.bf16 %v1415_v50, %v1414_v42  ;;  %2333 = vmatpush3.bf16.msra.mxu0 %v2662_v20  ;;  %p2824_p9 = por %p2823_p8, %p2822_p7 }
 0x609   :  { %2541 = vmatmul.mubr.bf16.gmra.mxu1 %v3155_v1  ;;  %p2825_p10 = pnand %p2824_p9, %p2818_p6 }
 0x60a   :  { %2560 = vmatprep.mubr.bf16.mxu1 %v2729_v6 }
 0x699   :  { %v3158_v63 = vpop.f32.mrf.mxu1 }
 0x69a   :  { %v1536_v57 = vadd.f32 %v3158_v63, %v1444_v16  ;;  %v2730_v63 = vld [vmem:[#allocation5 + $0x8] sm:$0xff]  }
 0x69b   :  { %v3160_v35 = vpop.f32.mrf.mxu1 }
 0x69c   :  { %v1592_v12 = vmax.f32 %v1536_v57, 0.0  ;;  %v1528_v47 = vadd.f32 %v3160_v35, %v1444_v16  ;;  %v2735_v35 = vld [vmem:[#allocation5 + $0x30] sm:$0xff]  }
 0x69d   :  { %v2531_v15 = vpop.f32.mrf.mxu1 }
 0x69e   :  { %v1539_v46 = vadd.f32 %v2531_v15, %v1444_v16 }
 0x69f   :  { %v1530_v18 = vpop.f32.mrf.mxu1 }
 0x6a0   :  { %v1593_v49 = vmax.f32 %v1539_v46, 0.0  ;;  %v1531_v11 = vadd.f32 %v1530_v18, %v1444_v16  ;;  %v2732_v18 = vld [vmem:[#allocation5 + $0x18] sm:$0xff]  }
 0x6a2   :  { %v1607_v13 = vpack.c.bf16 %v1593_v49, %v1592_v12  ;;  %v1591_v20 = vmax.f32 %v1531_v11, 0.0 }
 0x6a9   :  { %v2534_v19 = vpop.f32.mrf.mxu1 }
 0x6aa   :  { %v1552_v60 = vadd.f32 %v2534_v19, %v1444_v16  ;;  %v1590_v19 = vmax.f32 %v1528_v47, 0.0 }
 0x6ab   :  { %v1543_v23 = vpop.f32.mrf.mxu1 }
 0x6ac   :  { %v1596_v9 = vmax.f32 %v1552_v60, 0.0  ;;  %v1544_v45 = vadd.f32 %v1543_v23, %v1444_v16  ;;  %v1606_v15 = vpack.c.bf16 %v1591_v20, %v1590_v19  ;;  %v2731_v23 = vld [vmem:[#allocation5 + $0x10] sm:$0xff]  }
 0x6ad   :  { %v2535_v17 = vpop.f32.mrf.mxu1 }
 0x6ae   :  { %v1555_v34 = vadd.f32 %v2535_v17, %v1444_v16  ;;  %v1594_v10 = vmax.f32 %v1544_v45, 0.0  ;;  %v2733_v17 = vld [vmem:[#allocation5 + $0x20] sm:$0xff]  }
 0x6af   :  { %v1546_v24 = vpop.f32.mrf.mxu1 }
 0x6b0   :  { %v1597_v42 = vmax.f32 %v1555_v34, 0.0  ;;  %v1547_v50 = vadd.f32 %v1546_v24, %v1444_v16  ;;  %v2734_v24 = vld [vmem:[#allocation5 + $0x28] sm:$0xff]  }
 0x6b2   :  { %v1609_v54 = vpack.c.bf16 %v1597_v42, %v1596_v9  ;;  %v1595_v56 = vmax.f32 %v1547_v50, 0.0 }
 0x6b4   :  { %v1608_v48 = vpack.c.bf16 %v1595_v56, %v1594_v10 }
 0x6b9   :  { %v2538_v22 = vpop.f32.mrf.mxu1 }
 0x6ba   :  { %v1568_v55 = vadd.f32 %v2538_v22, %v1444_v16  ;;  %v2736_v22 = vld [vmem:[#allocation5 + $0x38] sm:$0xff]  }
 0x6bb   :  { %v1559_v25 = vpop.f32.mrf.mxu1 }
 0x6bc   :  { %v1600_v58 = vmax.f32 %v1568_v55, 0.0  ;;  %v1560_v2 = vadd.f32 %v1559_v25, %v1444_v16  ;;  %v2663_v25 = vld [vmem:[#allocation8 + $0x140] sm:$0xff]  }
 0x6bd   :  { %v2539_v28 = vpop.f32.mrf.mxu1  ;;  %2334 = vmatprep.subr.bf16.mxu0 %v2663_v25 }
 0x6be   :  { %v1571_v40 = vadd.f32 %v2539_v28, %v1444_v16  ;;  %v1598_v52 = vmax.f32 %v1560_v2, 0.0  ;;  %v2664_v28 = vld [vmem:[#allocation8 + $0x100] sm:$0xff]   ;;  %v3180_v2 = vrot.slane %v3165_v39, %v2976_v33 }
 0x6bf   :  { %v1562_v8 = vpop.f32.mrf.mxu1  ;;  %2335 = vmatpush3.bf16.msra.mxu0 %v2664_v28 }
 0x6c0   :  { %v1601_v27 = vmax.f32 %v1571_v40, 0.0  ;;  %v1563_v62 = vadd.f32 %v1562_v8, %v1444_v16 }
 0x6c2   :  { %v1611_v4 = vpack.c.bf16 %v1601_v27, %v1600_v58  ;;  %v1599_v21 = vmax.f32 %v1563_v62, 0.0 }
 0x6c4   :  { %v1610_v6 = vpack.c.bf16 %v1599_v21, %v1598_v52 }
 0x6c9   :  { %v2542_v5 = vpop.f32.mrf.mxu1 }
 0x6ca   :  { %v1584_v29 = vadd.f32 %v2542_v5, %v1444_v16 }
 0x6cb   :  { %v1575_v26 = vpop.f32.mrf.mxu1 }
 0x6cc   :  { %v1576_v31 = vadd.f32 %v1575_v26, %v1444_v16  ;;  %v1604_v32 = vmax.f32 %v1584_v29, 0.0 }
 0x6cd   :  { %v2543_v14 = vpop.f32.mrf.mxu1 }
 0x6ce   :  { %v1587_v30 = vadd.f32 %v2543_v14, %v1444_v16  ;;  %v1602_v7 = vmax.f32 %v1576_v31, 0.0 }
 0x6cf   :  { %v1578_v37 = vpop.f32.mrf.mxu1 }
 0x6d0   :  { %v1605_v44 = vmax.f32 %v1587_v30, 0.0  ;;  %v1579_v51 = vadd.f32 %v1578_v37, %v1444_v16 }
 0x6d2   :  { %v1613_v41 = vpack.c.bf16 %v1605_v44, %v1604_v32  ;;  %v1603_v3 = vmax.f32 %v1579_v51, 0.0 }
 0x6d4   :  { %v1612_v0 = vpack.c.bf16 %v1603_v3, %v1602_v7  ;;  %2544 = vmatprep.subr.bf16.mxu1 %v1613_v41 }
 0x6d5   :  { %2545 = vmatpush3.bf16.msra.mxu1 %v1613_v41 }
 0x6d6   :  { %2546 = vmatprep.subr.bf16.mxu1 %v1612_v0 }
 0x6d9   :  { %2547 = vmatpush3.bf16.msra.mxu1 %v1612_v0 }
 0x6da   :  { %2548 = vmatprep.subr.bf16.mxu1 %v1611_v4 }
 0x6dd   :  { %2549 = vmatpush3.bf16.msra.mxu1 %v1611_v4 }
 0x6de   :  { %2550 = vmatprep.subr.bf16.mxu1 %v1610_v6 }
 0x6e1   :  { %2551 = vmatpush3.bf16.msra.mxu1 %v1610_v6 }
 0x6e2   :  { %2552 = vmatprep.subr.bf16.mxu1 %v1609_v54 }
 0x6e5   :  { %2553 = vmatpush3.bf16.msra.mxu1 %v1609_v54 }
 0x6e6   :  { %2554 = vmatprep.subr.bf16.mxu1 %v1608_v48 }
 0x6e9   :  { %2555 = vmatpush3.bf16.msra.mxu1 %v1608_v48 }
 0x6ea   :  { %2556 = vmatprep.subr.bf16.mxu1 %v1607_v13 }
 0x6ed   :  { %2557 = vmatpush3.bf16.msra.mxu1 %v1607_v13 }
 0x6ee   :  { %2558 = vmatprep.subr.bf16.mxu1 %v1606_v15 }
 0x6f1   :  { %2559 = vmatpush3.bf16.msra.mxu1 %v1606_v15 }
 0x6f4   :  { %2561 = vmatmul.mubr.bf16.vlgmr.msra.gmra.mxu1 %v2730_v63 }
 0x6f5   :  { %2564 = vmatprep.mubr.bf16.mxu1 %v2731_v23 }
 0x6fc   :  { %2565 = vmatmul.mubr.bf16.gmra.mxu1 %v2732_v18 }
 0x6fd   :  { %2568 = vmatprep.mubr.bf16.mxu1 %v2733_v17 }
 0x704   :  { %2569 = vmatmul.mubr.bf16.gmra.mxu1 %v2734_v24 }
 0x705   :  { %2572 = vmatprep.mubr.bf16.mxu1 %v2735_v35 }
 0x70c   :  { %2573 = vmatmul.mubr.bf16.gmra.mxu1 %v2736_v22 }
 0x7b4   :  { %v2562_v8 = vpop.f32.mrf.mxu1 }
 0x7b6   :  { %v1648_v5 = vpop.f32.mrf.mxu1 }
 0x7b8   :  { %v2563_v16 = vpop.f32.mrf.mxu1 }
 0x7b9   :  { %v1712_v30 = vpack.c.bf16 %v2563_v16, %v2562_v8 }
 0x7ba   :  { %v1651_v26 = vpop.f32.mrf.mxu1 }
 0x7bb   :  { %v1711_v29 = vpack.c.bf16 %v1651_v26, %v1648_v5 }
 0x7bc   :  { %v2566_v14 = vpop.f32.mrf.mxu1 }
 0x7bd   :  { %1885 = vmatmul.mubr.bf16.vlgmr.msra.gmra.mxu0 %v1711_v29 }
 0x7be   :  { %1892 = vmatprep.mubr.bf16.mxu0 %v3109_v36  ;;  %v1664_v31 = vpop.f32.mrf.mxu1 }
 0x7c0   :  { %v2567_v37 = vpop.f32.mrf.mxu1 }
 0x7c1   :  { %v1714_v55 = vpack.c.bf16 %v2567_v37, %v2566_v14 }
 0x7c2   :  { %v1667_v40 = vpop.f32.mrf.mxu1 }
 0x7c3   :  { %v1713_v32 = vpack.c.bf16 %v1667_v40, %v1664_v31 }
 0x7c4   :  { %v2570_v44 = vpop.f32.mrf.mxu1 }
 0x7c5   :  { %1893 = vmatmul.mubr.bf16.gmra.mxu0 %v1712_v30 }
 0x7c6   :  { %1900 = vmatprep.mubr.bf16.mxu0 %v3126_v53  ;;  %v1680_v51 = vpop.f32.mrf.mxu1 }
 0x7c8   :  { %v2571_v7 = vpop.f32.mrf.mxu1 }
 0x7c9   :  { %v1716_v53 = vpack.c.bf16 %v2571_v7, %v2570_v44 }
 0x7ca   :  { %v1683_v41 = vpop.f32.mrf.mxu1 }
 0x7cb   :  { %v1715_v36 = vpack.c.bf16 %v1683_v41, %v1680_v51 }
 0x7cc   :  { %v2574_v3 = vpop.f32.mrf.mxu1 }
 0x7cd   :  { %1901 = vmatmul.mubr.bf16.gmra.mxu0 %v1713_v32 }
 0x7ce   :  { %1908 = vmatprep.mubr.bf16.mxu0 %v3135_v43  ;;  %v1696_v27 = vpop.f32.mrf.mxu1 }
 0x7d0   :  { %v2575_v62 = vpop.f32.mrf.mxu1 }
 0x7d1   :  { %v1718_v58 = vpack.c.bf16 %v2575_v62, %v2574_v3 }
 0x7d2   :  { %v1699_v0 = vpop.f32.mrf.mxu1 }
 0x7d3   :  { %v1717_v43 = vpack.c.bf16 %v1699_v0, %v1696_v27 }
 0x7d5   :  { %1909 = vmatmul.mubr.bf16.gmra.mxu0 %v1714_v55 }
 0x7d6   :  { %1916 = vmatprep.mubr.bf16.mxu0 %v3144_v38 }
 0x7dd   :  { %1917 = vmatmul.mubr.bf16.gmra.mxu0 %v1715_v36 }
 0x7de   :  { %1924 = vmatprep.mubr.bf16.mxu0 %v3149_v61 }
 0x7e5   :  { %1925 = vmatmul.mubr.bf16.gmra.mxu0 %v1716_v53 }
 0x7e6   :  { %1932 = vmatprep.mubr.bf16.mxu0 %v3152_v59 }
 0x7ed   :  { %1933 = vmatmul.mubr.bf16.gmra.mxu0 %v1717_v43 }
 0x7ee   :  { %1940 = vmatprep.mubr.bf16.mxu0 %v3155_v1 }
 0x7f5   :  { %1941 = vmatmul.mubr.bf16.gmra.mxu0 %v1718_v58 }
 0x87d   :  { %v2336_v38 = vpop.f32.mrf.mxu0 }
 0x87f   :  { %v2337_v34 = vpop.f32.mrf.mxu0 }
 0x880   :  { %v2338_v61 = vadd.f32 %v2337_v34, %v2336_v38 }
 0x881   :  { %v2339_v4 = vpop.f32.mrf.mxu0 }
 0x882   :  { %v1887_v21 = vadd.f32 %v2338_v61, %v3180_v2 }
 0x883   :  { %v2340_v60 = vpop.f32.mrf.mxu0 }
 0x884   :  { %1949 = vst [vmem:[#allocation10] sm:$0xff] %v1887_v21  ;;  %v2341_v59 = vadd.f32 %v2340_v60, %v2339_v4 }
 0x885   :  { %v2342_v52 = vpop.f32.mrf.mxu0 }
 0x886   :  { %v1890_v42 = vadd.f32 %v2341_v59, %v3180_v2 }
 0x887   :  { %v2343_v50 = vpop.f32.mrf.mxu0 }
 0x888   :  { %1950 = vst [vmem:[#allocation10 + $0x8] sm:$0xff] %v1890_v42  ;;  %v2344_v1 = vadd.f32 %v2343_v50, %v2342_v52 }
 0x889   :  { %v2345_v6 = vpop.f32.mrf.mxu0 }
 0x88a   :  { %v1895_v9 = vadd.f32 %v2344_v1, %v3180_v2 }
 0x88b   :  { %v2346_v45 = vpop.f32.mrf.mxu0 }
 0x88c   :  { %1951 = vst [vmem:[#allocation10 + $0x10] sm:$0xff] %v1895_v9  ;;  %v2347_v33 = vadd.f32 %v2346_v45, %v2345_v6 }
 0x88d   :  { %v2348_v39 = vpop.f32.mrf.mxu0 }
 0x88e   :  { %v1898_v46 = vadd.f32 %v2347_v33, %v3180_v2 }
 0x88f   :  { %v2349_v54 = vpop.f32.mrf.mxu0 }
 0x890   :  { %1952 = vst [vmem:[#allocation10 + $0x18] sm:$0xff] %v1898_v46  ;;  %v2350_v56 = vadd.f32 %v2349_v54, %v2348_v39 }
 0x891   :  { %v2351_v57 = vpop.f32.mrf.mxu0 }
 0x892   :  { %v1903_v10 = vadd.f32 %v2350_v56, %v3180_v2 }
 0x893   :  { %v2352_v49 = vpop.f32.mrf.mxu0 }
 0x894   :  { %1953 = vst [vmem:[#allocation10 + $0x20] sm:$0xff] %v1903_v10  ;;  %v2353_v11 = vadd.f32 %v2352_v49, %v2351_v57 }
 0x895   :  { %v2354_v48 = vpop.f32.mrf.mxu0 }
 0x896   :  { %v1906_v12 = vadd.f32 %v2353_v11, %v3180_v2 }
 0x897   :  { %v2355_v47 = vpop.f32.mrf.mxu0 }
 0x898   :  { %1954 = vst [vmem:[#allocation10 + $0x28] sm:$0xff] %v1906_v12  ;;  %v2356_v13 = vadd.f32 %v2355_v47, %v2354_v48 }
 0x899   :  { %v2357_v20 = vpop.f32.mrf.mxu0 }
 0x89a   :  { %v1911_v19 = vadd.f32 %v2356_v13, %v3180_v2 }
 0x89b   :  { %v2358_v15 = vpop.f32.mrf.mxu0 }
 0x89c   :  { %1955 = vst [vmem:[#allocation10 + $0x30] sm:$0xff] %v1911_v19  ;;  %v2359_v63 = vadd.f32 %v2358_v15, %v2357_v20 }
 0x89d   :  { %v2360_v23 = vpop.f32.mrf.mxu0 }
 0x89e   :  { %v1914_v18 = vadd.f32 %v2359_v63, %v3180_v2 }
 0x89f   :  { %v2361_v17 = vpop.f32.mrf.mxu0 }
 0x8a0   :  { %1956 = vst [vmem:[#allocation10 + $0x38] sm:$0xff] %v1914_v18  ;;  %v2362_v24 = vadd.f32 %v2361_v17, %v2360_v23 }
 0x8a1   :  { %v2363_v35 = vpop.f32.mrf.mxu0 }
 0x8a2   :  { %v1919_v22 = vadd.f32 %v2362_v24, %v3180_v2 }
 0x8a3   :  { %v2364_v25 = vpop.f32.mrf.mxu0 }
 0x8a4   :  { %1957 = vst [vmem:[#allocation10 + $0x40] sm:$0xff] %v1919_v22  ;;  %v2365_v28 = vadd.f32 %v2364_v25, %v2363_v35 }
 0x8a5   :  { %v2366_v8 = vpop.f32.mrf.mxu0 }
 0x8a6   :  { %v1922_v5 = vadd.f32 %v2365_v28, %v3180_v2 }
 0x8a7   :  { %v2367_v16 = vpop.f32.mrf.mxu0 }
 0x8a8   :  { %1958 = vst [vmem:[#allocation10 + $0x48] sm:$0xff] %v1922_v5  ;;  %v2368_v26 = vadd.f32 %v2367_v16, %v2366_v8 }
 0x8a9   :  { %v2369_v29 = vpop.f32.mrf.mxu0 }
 0x8aa   :  { %v1927_v14 = vadd.f32 %v2368_v26, %v3180_v2 }
 0x8ab   :  { %v2370_v31 = vpop.f32.mrf.mxu0 }
 0x8ac   :  { %1959 = vst [vmem:[#allocation10 + $0x50] sm:$0xff] %v1927_v14  ;;  %v2371_v30 = vadd.f32 %v2370_v31, %v2369_v29 }
 0x8ad   :  { %v2372_v37 = vpop.f32.mrf.mxu0 }
 0x8ae   :  { %v1930_v40 = vadd.f32 %v2371_v30, %v3180_v2 }
 0x8af   :  { %v2373_v32 = vpop.f32.mrf.mxu0 }
 0x8b0   :  { %1960 = vst [vmem:[#allocation10 + $0x58] sm:$0xff] %v1930_v40  ;;  %v2374_v44 = vadd.f32 %v2373_v32, %v2372_v37 }
 0x8b1   :  { %v2375_v51 = vpop.f32.mrf.mxu0 }
 0x8b2   :  { %v1935_v55 = vadd.f32 %v2374_v44, %v3180_v2 }
 0x8b3   :  { %v2376_v7 = vpop.f32.mrf.mxu0 }
 0x8b4   :  { %1961 = vst [vmem:[#allocation10 + $0x60] sm:$0xff] %v1935_v55  ;;  %v2377_v41 = vadd.f32 %v2376_v7, %v2375_v51 }
 0x8b5   :  { %v2378_v36 = vpop.f32.mrf.mxu0 }
 0x8b6   :  { %v1938_v3 = vadd.f32 %v2377_v41, %v3180_v2 }
 0x8b7   :  { %v2379_v27 = vpop.f32.mrf.mxu0 }
 0x8b8   :  { %1962 = vst [vmem:[#allocation10 + $0x68] sm:$0xff] %v1938_v3  ;;  %v2380_v53 = vadd.f32 %v2379_v27, %v2378_v36 }
 0x8b9   :  { %v2381_v62 = vpop.f32.mrf.mxu0 }
 0x8ba   :  { %v1943_v0 = vadd.f32 %v2380_v53, %v3180_v2 }
 0x8bb   :  { %v2382_v43 = vpop.f32.mrf.mxu0 }
 0x8bc   :  { %1963 = vst [vmem:[#allocation10 + $0x70] sm:$0xff] %v1943_v0  ;;  %v2383_v58 = vadd.f32 %v2382_v43, %v2381_v62 }
 0x8be   :  { %v1946_v38 = vadd.f32 %v2383_v58, %v3180_v2 }
 0x8c0   :  { %1964 = vst [vmem:[#allocation10 + $0x78] sm:$0xff] %v1946_v38 }
 0x8c1   :  { %2828 = shalt.err (!%p2825_p10)
}
 0x8c2   :  { %1976 = dma.vmem_to_hbm [thread:$0]  %s1971_s19, 2048, %s3209_s5, [#allocation4], %s2849_s28, %s2849_s28, %s2850_s29  }
 0x8c3   :  { %2843 = dma.done.wait [#allocation4], 2048  }
 0x8c4   :  { %2844 = vsyncadd [#allocation4], 4294965248 }
 0x8c5   :  { %1980 = vsyncpa [#allocation3], 1 }
 0x8c6   :  { %1981 = vsyncpa [#allocation6], 1 }
 0x8c7   :  { %1982 = vsyncpa [#allocation9], 1 }
 0x8c8   :  { %1983 = vsyncpa [#allocation4], 1 }

</bundles_post_ra>
